<compile_context>
chip_gen: v7x
topology: tpu7x:2x2x1
jax: 0.10.0
libtpu: 0.0.40
codegen_flags: <defaults>
</compile_context>

<pallas_src>
import functools
import math

import numpy as np
import jax
import jax.numpy as jnp
from jax import lax
from jax.experimental import pallas as pl
from jax.experimental.pallas import tpu as pltpu


# -----------------------------------------------------------------------------
# Tile helpers (demo shapes are small, so these mostly return the full dim)
# -----------------------------------------------------------------------------
def _row_tile(n, cap=256):
    """Sublane (second-minor) tile: prefer a multiple of 8 that divides n."""
    if n <= cap:
        return n
    t = (cap // 8) * 8
    while t >= 8:
        if n % t == 0:
            return t
        t -= 8
    return n


def _lane_tile(n, cap=512):
    """Lane (minor) tile: prefer a multiple of 128 that divides n."""
    if n <= cap:
        return n
    t = (cap // 128) * 128
    while t >= 128:
        if n % t == 0:
            return t
        t -= 128
    return n


# -----------------------------------------------------------------------------
# RMSNorm kernel
# -----------------------------------------------------------------------------
def _rmsnorm_kernel(scale_ref, x_ref, o_ref, *, eps):
    x = x_ref[...].astype(jnp.float32)                       # (tm, D)
    ms = jnp.mean(x * x, axis=-1, keepdims=True)              # (tm, 1)
    inv = 1.0 / jnp.sqrt(ms + eps)
    o_ref[...] = (scale_ref[...] * (x * inv)).astype(o_ref.dtype)


def rmsnorm(x2d, scale, eps):
    n, d = x2d.shape
    tm = _row_tile(n)
    grid_spec = pltpu.PrefetchScalarGridSpec(
        num_scalar_prefetch=0,
        grid=(n // tm,),
        in_specs=[
            pl.BlockSpec((1, 1), lambda i: (0, 0)),            # scalar scale
            pl.BlockSpec((tm, d), lambda i: (i, 0)),
        ],
        out_specs=pl.BlockSpec((tm, d), lambda i: (i, 0)),
    )
    return pl.pallas_call(
        functools.partial(_rmsnorm_kernel, eps=eps),
        out_shape=jax.ShapeDtypeStruct((n, d), x2d.dtype),
        grid_spec=grid_spec,
        compiler_params=pltpu.CompilerParams(dimension_semantics=("parallel",)),
    )(scale, x2d)


# -----------------------------------------------------------------------------
# Tiled matmul kernel: x (M, K) @ w_t (K, N) -> (M, N)
# (torch Linear weights are pre-transposed to (in, out) in the wrapper)
# -----------------------------------------------------------------------------
def _matmul_kernel(x_ref, w_ref, o_ref, acc_ref):
    @pl.when(pl.program_id(2) == 0)
    def _():
        acc_ref[...] = jnp.zeros_like(acc_ref)

    acc_ref[...] += jnp.dot(x_ref[...], w_ref[...],
                            preferred_element_type=jnp.float32)

    @pl.when(pl.program_id(2) == pl.num_programs(2) - 1)
    def _():
        o_ref[...] = acc_ref[...].astype(o_ref.dtype)


def linear(x2d, w_t):
    m, k = x2d.shape
    k2, n = w_t.shape
    assert k == k2
    tm = _row_tile(m)
    tn = _lane_tile(n)
    tk = _lane_tile(k)
    grid_spec = pltpu.PrefetchScalarGridSpec(
        num_scalar_prefetch=0,
        grid=(m // tm, n // tn, k // tk),
        in_specs=[
            pl.BlockSpec((tm, tk), lambda i, j, kk: (i, kk)),
            pl.BlockSpec((tk, tn), lambda i, j, kk: (kk, j)),
        ],
        out_specs=pl.BlockSpec((tm, tn), lambda i, j, kk: (i, j)),
        scratch_shapes=[pltpu.VMEM((tm, tn), jnp.float32)],
    )
    return pl.pallas_call(
        _matmul_kernel,
        out_shape=jax.ShapeDtypeStruct((m, n), x2d.dtype),
        grid_spec=grid_spec,
        compiler_params=pltpu.CompilerParams(
            dimension_semantics=("parallel", "parallel", "arbitrary")),
    )(x2d, w_t)


# -----------------------------------------------------------------------------
# RoPE kernel: lane-dense (B, S, d_model) with pre-gathered / pre-expanded tables
#   out = x * cos_dup + pair_swap(x) * sin_signed
# pair_swap is done with two XLU rolls + a parity select (no MXU, no one-hot).
# -----------------------------------------------------------------------------
def _rope_kernel(x_ref, cos_ref, sin_ref, o_ref):
    x = x_ref[0].astype(jnp.float32)                 # (S, D)
    c = cos_ref[...]
    s = sin_ref[...]
    d = x.shape[-1]
    lane = lax.broadcasted_iota(jnp.int32, x.shape, 1)
    is_even = (lane % 2) == 0
    x_next = pltpu.roll(x, d - 1, axis=1)            # y[j] = x[(j + 1) % d]
    x_prev = pltpu.roll(x, 1, axis=1)                # y[j] = x[(j - 1) % d]
    x_swap = jnp.where(is_even, x_next, x_prev)      # (2k, 2k+1) pair swap
    o_ref[0] = (x * c + x_swap * s).astype(o_ref.dtype)


def rope_apply(x, cos_full, sin_full):
    b, s, d = x.shape
    grid_spec = pltpu.PrefetchScalarGridSpec(
        num_scalar_prefetch=0,
        grid=(b,),
        in_specs=[
            pl.BlockSpec((1, s, d), lambda i: (i, 0, 0)),
            pl.BlockSpec((s, d), lambda i: (0, 0)),
            pl.BlockSpec((s, d), lambda i: (0, 0)),
        ],
        out_specs=pl.BlockSpec((1, s, d), lambda i: (i, 0, 0)),
    )
    return pl.pallas_call(
        _rope_kernel,
        out_shape=jax.ShapeDtypeStruct((b, s, d), x.dtype),
        grid_spec=grid_spec,
        compiler_params=pltpu.CompilerParams(dimension_semantics=("parallel",)),
    )(x, cos_full, sin_full)


def _expand_rope_tables(cos_tab, sin_tab, positions, num_heads):
    """Gather (plain XLA take, hoisted out of the kernel) + expand to the
    duplicated / sign-folded (S, d_model) layout consumed by _rope_kernel."""
    cos_g = jnp.take(cos_tab, positions, axis=0)      # (S, d_k//2)
    sin_g = jnp.take(sin_tab, positions, axis=0)
    s, c = cos_g.shape
    cos_dup = jnp.repeat(cos_g, 2, axis=-1)                              # [c0,c0,c1,c1,...]
    sin_signed = jnp.stack([-sin_g, sin_g], axis=-1).reshape(s, 2 * c)   # [-s0,s0,-s1,s1,...]
    cos_full = jnp.tile(cos_dup, (1, num_heads))                         # (S, d_model)
    sin_full = jnp.tile(sin_signed, (1, num_heads))
    return cos_full, sin_full


# -----------------------------------------------------------------------------
# Causal attention kernel: one (batch, head) tile per grid step
# -----------------------------------------------------------------------------
def _attention_kernel(q_ref, k_ref, v_ref, o_ref, *, sm_scale):
    q = q_ref[0, 0].astype(jnp.float32)               # (S, dh)
    k = k_ref[0, 0].astype(jnp.float32)
    v = v_ref[0, 0].astype(jnp.float32)
    s = lax.dot_general(q, k, (((1,), (1,)), ((), ())),
                        preferred_element_type=jnp.float32) * sm_scale   # (S, S)
    n = q.shape[0]
    row = lax.broadcasted_iota(jnp.int32, (n, n), 0)
    col = lax.broadcasted_iota(jnp.int32, (n, n), 1)
    s = jnp.where(col <= row, s, -1e30)
    m = jnp.max(s, axis=-1, keepdims=True)
    p = jnp.exp(s - m)
    l = jnp.sum(p, axis=-1, keepdims=True)
    o = jnp.dot(p, v, preferred_element_type=jnp.float32) / l
    o_ref[0, 0] = o.astype(o_ref.dtype)


def causal_attention(qh, kh, vh):
    # TODO(synk): for long sequences this should be the flash-attention pattern
    # (online softmax over KV tiles); at demo sizes a single-tile softmax is exact.
    b, h, s, dh = qh.shape

    def mk_spec():
        return pl.BlockSpec((1, 1, s, dh), lambda i, j: (i, j, 0, 0))

    grid_spec = pltpu.PrefetchScalarGridSpec(
        num_scalar_prefetch=0,
        grid=(b, h),
        in_specs=[mk_spec(), mk_spec(), mk_spec()],
        out_specs=mk_spec(),
    )
    return pl.pallas_call(
        functools.partial(_attention_kernel, sm_scale=1.0 / math.sqrt(dh)),
        out_shape=jax.ShapeDtypeStruct((b, h, s, dh), qh.dtype),
        grid_spec=grid_spec,
        compiler_params=pltpu.CompilerParams(
            dimension_semantics=("parallel", "parallel")),
    )(qh, kh, vh)


# -----------------------------------------------------------------------------
# Fused SwiGLU kernel: (silu(x @ W1t) * (x @ W3t)) @ W2t
# -----------------------------------------------------------------------------
def _swiglu_kernel(x_ref, w1_ref, w3_ref, w2_ref, o_ref):
    x = x_ref[...].astype(jnp.float32)                                   # (tm, D)
    h1 = jnp.dot(x, w1_ref[...], preferred_element_type=jnp.float32)     # (tm, F)
    h3 = jnp.dot(x, w3_ref[...], preferred_element_type=jnp.float32)     # (tm, F)
    gate = h1 * (1.0 / (1.0 + jnp.exp(-h1)))                             # SiLU
    o_ref[...] = jnp.dot(gate * h3, w2_ref[...],
                         preferred_element_type=jnp.float32).astype(o_ref.dtype)


def swiglu(x2d, w1_t, w3_t, w2_t):
    n, d = x2d.shape
    f = w1_t.shape[1]
    tm = _row_tile(n)
    grid_spec = pltpu.PrefetchScalarGridSpec(
        num_scalar_prefetch=0,
        grid=(n // tm,),
        in_specs=[
            pl.BlockSpec((tm, d), lambda i: (i, 0)),
            pl.BlockSpec((d, f), lambda i: (0, 0)),
            pl.BlockSpec((d, f), lambda i: (0, 0)),
            pl.BlockSpec((f, d), lambda i: (0, 0)),
        ],
        out_specs=pl.BlockSpec((tm, d), lambda i: (i, 0)),
    )
    return pl.pallas_call(
        _swiglu_kernel,
        out_shape=jax.ShapeDtypeStruct((n, d), x2d.dtype),
        grid_spec=grid_spec,
        compiler_params=pltpu.CompilerParams(dimension_semantics=("parallel",)),
    )(x2d, w1_t, w3_t, w2_t)


# -----------------------------------------------------------------------------
# Parameters / RoPE tables (deterministic, mirrors the torch module __init__)
# -----------------------------------------------------------------------------
def make_rope_tables(theta, d_k, max_seq_len):
    assert d_k % 2 == 0
    num_cos = d_k // 2
    powers = 2.0 * np.arange(num_cos, dtype=np.float64) / float(d_k)
    thetas = np.power(np.float64(1.0 / theta), powers).astype(np.float32)
    positions = np.arange(max_seq_len, dtype=np.float32)
    angles = positions[:, None] * thetas[None, :]
    return jnp.asarray(np.cos(angles), jnp.float32), jnp.asarray(np.sin(angles), jnp.float32)


def init_params(key, cfg):
    d, f, v = cfg["d_model"], cfg["d_ff"], cfg["vocab_size"]
    n_layers = cfg["num_layers"]
    keys = jax.random.split(key, 2 + 7 * n_layers)
    kit = iter(keys)

    def trunc(k, shape, std):
        return (std * jax.random.truncated_normal(k, -3.0, 3.0, shape)).astype(jnp.float32)

    def lin_t(k, d_in, d_out):
        # torch Linear stores (out, in) and computes x @ W.T; we store W.T = (in, out).
        std = 2.0 / math.sqrt(d_in + d_out)
        return trunc(k, (d_in, d_out), std)

    params = {
        "embed": trunc(next(kit), (v, d), 1.0),
        "lm_head_t": lin_t(next(kit), d, v),
        "scale_head": jnp.ones((1, 1), jnp.float32),
        "layers": [],
    }
    for _ in range(n_layers):
        wq = lin_t(next(kit), d, d)
        wk = lin_t(next(kit), d, d)
        wv = lin_t(next(kit), d, d)
        params["layers"].append({
            "scale_attn": jnp.ones((1, 1), jnp.float32),
            "scale_ffn": jnp.ones((1, 1), jnp.float32),
            "wqkv_t": jnp.concatenate([wq, wk, wv], axis=1),   # fused QKV: (d, 3d), lane-dense out
            "wo_t": lin_t(next(kit), d, d),
            "w1_t": lin_t(next(kit), d, f),
            "w3_t": lin_t(next(kit), d, f),
            "w2_t": lin_t(next(kit), f, d),
        })
    return params


# -----------------------------------------------------------------------------
# Full forward pass (Pallas kernel path)
# -----------------------------------------------------------------------------
def transformer_lm_forward(token_ids, params, rope_cos, rope_sin, cfg):
    b, s = token_ids.shape
    d, h = cfg["d_model"], cfg["num_heads"]
    dh = d // h
    n = b * s
    eps = cfg["eps"]
    assert d % h == 0 and dh % 2 == 0
    assert s <= cfg["context_length"]   # mirrors torch's runtime position check

    # TODO(synk): embedding gather stays as a plain XLA take (hoisted per the perf
    # guidance to keep gathers out of the kernels).
    x = jnp.take(params["embed"], token_ids.reshape(-1).astype(jnp.int32),
                 axis=0).reshape(b, s, d)

    positions = jnp.arange(s, dtype=jnp.int32)
    cos_full, sin_full = _expand_rope_tables(rope_cos, rope_sin, positions, h)

    for layer in params["layers"]:
        # --- attention sublayer: y = x + MHA(RMSNorm(x)) ---
        hnorm = rmsnorm(x.reshape(n, d), layer["scale_attn"], eps)
        qkv = linear(hnorm, layer["wqkv_t"])                        # (n, 3d)
        q = rope_apply(qkv[:, 0 * d:1 * d].reshape(b, s, d), cos_full, sin_full)
        k = rope_apply(qkv[:, 1 * d:2 * d].reshape(b, s, d), cos_full, sin_full)
        v = qkv[:, 2 * d:3 * d].reshape(b, s, d)
        qh = q.reshape(b, s, h, dh).transpose(0, 2, 1, 3)
        kh = k.reshape(b, s, h, dh).transpose(0, 2, 1, 3)
        vh = v.reshape(b, s, h, dh).transpose(0, 2, 1, 3)
        oh = causal_attention(qh, kh, vh)                           # (b, h, s, dh)
        o2d = oh.transpose(0, 2, 1, 3).reshape(n, d)
        x = x + linear(o2d, layer["wo_t"]).reshape(b, s, d)

        # --- feed-forward sublayer: y = y + SwiGLU(RMSNorm(y)) ---
        hnorm = rmsnorm(x.reshape(n, d), layer["scale_ffn"], eps)
        x = x + swiglu(hnorm, layer["w1_t"], layer["w3_t"], layer["w2_t"]).reshape(b, s, d)

    xf = rmsnorm(x.reshape(n, d), params["scale_head"], eps)
    logits = linear(xf, params["lm_head_t"])
    return logits.reshape(b, s, cfg["vocab_size"])


# -----------------------------------------------------------------------------
# Pure-JAX reference (mirrors the PyTorch modules; exact-precision matmuls)
# -----------------------------------------------------------------------------
_HI = jax.lax.Precision.HIGHEST


def transformer_lm_reference(token_ids, params, rope_cos, rope_sin, cfg):
    b, s = token_ids.shape
    d, h = cfg["d_model"], cfg["num_heads"]
    dh = d // h
    eps = cfg["eps"]

    def mm(a, w):
        return jnp.matmul(a, w, precision=_HI)

    def rms(x, scale):
        ms = jnp.mean(jnp.square(x.astype(jnp.float32)), axis=-1, keepdims=True)
        return scale[0, 0] * (x / jnp.sqrt(ms + eps))

    def rope(xh, positions):            # xh: (b, h, s, dh), interleaved pairs
        cos = rope_cos[positions]        # (s, dh//2)
        sin = rope_sin[positions]
        xe = xh[..., 0::2]
        xo = xh[..., 1::2]
        oe = xe * cos - xo * sin
        oo = xe * sin + xo * cos
        return jnp.stack([oe, oo], axis=-1).reshape(xh.shape)

    positions = jnp.arange(s, dtype=jnp.int32)
    x = params["embed"][token_ids]
    for layer in params["layers"]:
        hn = rms(x, layer["scale_attn"])
        wq_t = layer["wqkv_t"][:, 0 * d:1 * d]
        wk_t = layer["wqkv_t"][:, 1 * d:2 * d]
        wv_t = layer["wqkv_t"][:, 2 * d:3 * d]
        q = mm(hn, wq_t).reshape(b, s, h, dh).transpose(0, 2, 1, 3)
        k = mm(hn, wk_t).reshape(b, s, h, dh).transpose(0, 2, 1, 3)
        v = mm(hn, wv_t).reshape(b, s, h, dh).transpose(0, 2, 1, 3)
        q = rope(q, positions)
        k = rope(k, positions)
        score = jnp.einsum("bhqd,bhkd->bhqk", q, k, precision=_HI) / math.sqrt(dh)
        mask = jnp.tril(jnp.ones((s, s), dtype=bool))
        score = jnp.where(mask[None, None], score, -1e30)
        prob = jax.nn.softmax(score, axis=-1)
        o = jnp.einsum("bhqk,bhkd->bhqd", prob, v, precision=_HI)
        o = o.transpose(0, 2, 1, 3).reshape(b, s, d)
        x = x + mm(o, layer["wo_t"])

        hn = rms(x, layer["scale_ffn"])
        h1 = mm(hn, layer["w1_t"])
        h3 = mm(hn, layer["w3_t"])
        x = x + mm(h1 * jax.nn.sigmoid(h1) * h3, layer["w2_t"])

    x = rms(x, params["scale_head"])
    return mm(x, params["lm_head_t"])


# -----------------------------------------------------------------------------
# Demo / correctness check
# -----------------------------------------------------------------------------
if __name__ == "__main__":
    cfg = dict(
        vocab_size=256,
        context_length=64,
        num_layers=2,
        d_model=128,
        num_heads=4,
        d_ff=256,
        rope_theta=10000.0,
        eps=1e-5,
    )
    B, S = 2, 16

    key = jax.random.PRNGKey(0)
    k_param, k_tok = jax.random.split(key)
    params = init_params(k_param, cfg)
    rope_cos, rope_sin = make_rope_tables(
        cfg["rope_theta"], cfg["d_model"] // cfg["num_heads"], cfg["context_length"])
    token_ids = jax.random.randint(k_tok, (B, S), 0, cfg["vocab_size"], dtype=jnp.int32)

    fwd = jax.jit(functools.partial(transformer_lm_forward, cfg=cfg))
    logits = jax.block_until_ready(fwd(token_ids, params, rope_cos, rope_sin))
    assert logits.shape == (B, S, cfg["vocab_size"])

    ref = transformer_lm_reference(token_ids, params, rope_cos, rope_sin, cfg)
    np.testing.assert_allclose(np.asarray(logits), np.asarray(ref), rtol=5e-3, atol=5e-3)

    print("KERNEL_OK")
</pallas_src>

<mosaic_0001>
module attributes {stable_mosaic.version = 11 : i64} {
  func.func @_rmsnorm_kernel(%arg0: i32, %arg1: memref<1x1xf32, #tpu.memory_space<vmem>>, %arg2: memref<32x128xf32, #tpu.memory_space<vmem>>, %arg3: memref<32x128xf32, #tpu.memory_space<vmem>>) attributes {dimension_semantics = [#tpu.dimension_semantics<parallel>], iteration_bounds = array<i64: 1>, scalar_prefetch = 0 : i64, scratch_operands = 0 : i64, tpu.core_type = #tpu.core_type<tc>, window_params = [{pipeline_mode = #tpu.pipeline_mode<synchronous>, transform_indices = @transform_0, window_bounds = array<i64: 1, 1>}, {transform_indices = @transform_1, window_bounds = array<i64: 32, 128>}, {transform_indices = @transform_2, window_bounds = array<i64: 32, 128>}]} {
    %c0 = arith.constant 0 : index
    %c0_0 = arith.constant 0 : index
    %0 = vector.load %arg2[%c0, %c0_0] : memref<32x128xf32, #tpu.memory_space<vmem>>, vector<32x128xf32>
    %1 = arith.mulf %0, %0 : vector<32x128xf32>
    %cst = arith.constant dense<0.000000e+00> : vector<32xf32>
    %2 = vector.multi_reduction <add>, %1, %cst [1] : vector<32x128xf32> to vector<32xf32>
    %3 = vector.shape_cast %2 : vector<32xf32> to vector<32x1xf32>
    %cst_1 = arith.constant 1.280000e+02 : f32
    %4 = vector.broadcast %cst_1 : f32 to vector<32x1xf32>
    %5 = arith.divf %3, %4 : vector<32x1xf32>
    %cst_2 = arith.constant 9.99999974E-6 : f32
    %6 = vector.broadcast %cst_2 : f32 to vector<32x1xf32>
    %7 = arith.addf %5, %6 : vector<32x1xf32>
    %8 = math.sqrt %7 : vector<32x1xf32>
    %cst_3 = arith.constant 1.000000e+00 : f32
    %9 = vector.broadcast %cst_3 : f32 to vector<32x1xf32>
    %10 = arith.divf %9, %8 : vector<32x1xf32>
    %c0_4 = arith.constant 0 : index
    %c0_5 = arith.constant 0 : index
    %11 = vector.load %arg1[%c0_4, %c0_5] : memref<1x1xf32, #tpu.memory_space<vmem>>, vector<1x1xf32>
    %12 = vector.broadcast %10 : vector<32x1xf32> to vector<32x128xf32>
    %13 = arith.mulf %0, %12 : vector<32x128xf32>
    %14 = vector.broadcast %11 : vector<1x1xf32> to vector<32x128xf32>
    %15 = arith.mulf %14, %13 : vector<32x128xf32>
    %c0_6 = arith.constant 0 : index
    %c0_7 = arith.constant 0 : index
    %16 = vector.load %arg3[%c0_6, %c0_7] : memref<32x128xf32, #tpu.memory_space<vmem>>, vector<32x128xf32>
    tpu.vector_store %arg3[%c0_6, %c0_7], %15 {strides = array<i32>} : memref<32x128xf32, #tpu.memory_space<vmem>>, vector<32x128xf32>,
    return
  }
  func.func @transform_0(%arg0: i32) -> (i32, i32) {
    %c0_i32 = arith.constant 0 : i32
    %c0_i32_0 = arith.constant 0 : i32
    %c0_i32_1 = arith.constant 0 : i32
    return %c0_i32, %c0_i32_0 : i32, i32
  }
  func.func @transform_1(%arg0: i32) -> (i32, i32) {
    %c0_i32 = arith.constant 0 : i32
    %c0_i32_0 = arith.constant 0 : i32
    return %arg0, %c0_i32 : i32, i32
  }
  func.func @transform_2(%arg0: i32) -> (i32, i32) {
    %c0_i32 = arith.constant 0 : i32
    %c0_i32_0 = arith.constant 0 : i32
    return %arg0, %c0_i32 : i32, i32
  }
}

module attributes {stable_mosaic.version = 11 : i64} {
  func.func @_matmul_kernel(%arg0: i32, %arg1: i32, %arg2: i32, %arg3: memref<32x128xf32, #tpu.memory_space<vmem>>, %arg4: memref<128x384xf32, #tpu.memory_space<vmem>>, %arg5: memref<32x384xf32, #tpu.memory_space<vmem>>, %arg6: memref<32x384xf32, #tpu.memory_space<vmem>>) attributes {dimension_semantics = [#tpu.dimension_semantics<parallel>, #tpu.dimension_semantics<parallel>, #tpu.dimension_semantics<arbitrary>], iteration_bounds = array<i64: 1, 1, 1>, scalar_prefetch = 0 : i64, scratch_operands = 1 : i64, tpu.core_type = #tpu.core_type<tc>, window_params = [{transform_indices = @transform_0, window_bounds = array<i64: 32, 128>}, {transform_indices = @transform_1, window_bounds = array<i64: 128, 384>}, {transform_indices = @transform_2, window_bounds = array<i64: 32, 384>}]} {
    %c0_i32 = arith.constant 0 : i32
    %0 = arith.cmpi eq, %arg2, %c0_i32 : i32
    %1 = arith.extui %0 : i1 to i32
    %c0_i32_0 = arith.constant 0 : i32
    %2 = arith.cmpi ne, %1, %c0_i32_0 : i32
    scf.if %2 {
      %cst_10 = arith.constant 0.000000e+00 : f32
      %12 = vector.broadcast %cst_10 : f32 to vector<32x384xf32>
      %c0_11 = arith.constant 0 : index
      %c0_12 = arith.constant 0 : index
      %13 = vector.load %arg6[%c0_11, %c0_12] : memref<32x384xf32, #tpu.memory_space<vmem>>, vector<32x384xf32>
      tpu.vector_store %arg6[%c0_11, %c0_12], %12 {strides = array<i32>} : memref<32x384xf32, #tpu.memory_space<vmem>>, vector<32x384xf32>,
    } else {
    }
    %c0 = arith.constant 0 : index
    %c0_1 = arith.constant 0 : index
    %3 = vector.load %arg6[%c0, %c0_1] : memref<32x384xf32, #tpu.memory_space<vmem>>, vector<32x384xf32>
    %c0_2 = arith.constant 0 : index
    %c0_3 = arith.constant 0 : index
    %4 = vector.load %arg3[%c0_2, %c0_3] : memref<32x128xf32, #tpu.memory_space<vmem>>, vector<32x128xf32>
    %c0_4 = arith.constant 0 : index
    %c0_5 = arith.constant 0 : index
    %5 = vector.load %arg4[%c0_4, %c0_5] : memref<128x384xf32, #tpu.memory_space<vmem>>, vector<128x384xf32>
    %cst = arith.constant dense<0.000000e+00> : vector<32x384xf32>
    %6 = tpu.matmul %4, %5, %cst {dimension_numbers = #tpu.dot_dimension_numbers<[1], [0], [0], [1], [0, 0, 1, 1], [], []>} : vector<32x128xf32>, vector<128x384xf32>, vector<32x384xf32> -> vector<32x384xf32>
    %7 = arith.addf %3, %6 : vector<32x384xf32>
    %c0_6 = arith.constant 0 : index
    %c0_7 = arith.constant 0 : index
    %8 = vector.load %arg6[%c0_6, %c0_7] : memref<32x384xf32, #tpu.memory_space<vmem>>, vector<32x384xf32>
    tpu.vector_store %arg6[%c0_6, %c0_7], %7 {strides = array<i32>} : memref<32x384xf32, #tpu.memory_space<vmem>>, vector<32x384xf32>,
    %c0_i32_8 = arith.constant 0 : i32
    %9 = arith.cmpi eq, %arg2, %c0_i32_8 : i32
    %10 = arith.extui %9 : i1 to i32
    %c0_i32_9 = arith.constant 0 : i32
    %11 = arith.cmpi ne, %10, %c0_i32_9 : i32
    scf.if %11 {
      %c0_10 = arith.constant 0 : index
      %c0_11 = arith.constant 0 : index
      %12 = vector.load %arg6[%c0_10, %c0_11] : memref<32x384xf32, #tpu.memory_space<vmem>>, vector<32x384xf32>
      %c0_12 = arith.constant 0 : index
      %c0_13 = arith.constant 0 : index
      %13 = vector.load %arg5[%c0_12, %c0_13] : memref<32x384xf32, #tpu.memory_space<vmem>>, vector<32x384xf32>
      tpu.vector_store %arg5[%c0_12, %c0_13], %12 {strides = array<i32>} : memref<32x384xf32, #tpu.memory_space<vmem>>, vector<32x384xf32>,
    } else {
    }
    return
  }
  func.func @transform_0(%arg0: i32, %arg1: i32, %arg2: i32) -> (i32, i32) {
    %c0_i32 = arith.constant 0 : i32
    return %arg0, %arg2 : i32, i32
  }
  func.func @transform_1(%arg0: i32, %arg1: i32, %arg2: i32) -> (i32, i32) {
    %c0_i32 = arith.constant 0 : i32
    return %arg2, %arg1 : i32, i32
  }
  func.func @transform_2(%arg0: i32, %arg1: i32, %arg2: i32) -> (i32, i32) {
    %c0_i32 = arith.constant 0 : i32
    return %arg0, %arg1 : i32, i32
  }
}

module attributes {stable_mosaic.version = 11 : i64} {
  func.func @_rope_kernel(%arg0: i32, %arg1: memref<1x16x128xf32, #tpu.memory_space<vmem>>, %arg2: memref<16x128xf32, #tpu.memory_space<vmem>>, %arg3: memref<16x128xf32, #tpu.memory_space<vmem>>, %arg4: memref<1x16x128xf32, #tpu.memory_space<vmem>>) attributes {dimension_semantics = [#tpu.dimension_semantics<parallel>], iteration_bounds = array<i64: 2>, scalar_prefetch = 0 : i64, scratch_operands = 0 : i64, tpu.core_type = #tpu.core_type<tc>, window_params = [{transform_indices = @transform_0, window_bounds = array<i64: 1, 16, 128>}, {pipeline_mode = #tpu.pipeline_mode<synchronous>, transform_indices = @transform_1, window_bounds = array<i64: 16, 128>}, {pipeline_mode = #tpu.pipeline_mode<synchronous>, transform_indices = @transform_2, window_bounds = array<i64: 16, 128>}, {transform_indices = @transform_3, window_bounds = array<i64: 1, 16, 128>}]} {
    %c0 = arith.constant 0 : index
    %c0_0 = arith.constant 0 : index
    %c0_1 = arith.constant 0 : index
    %0 = vector.load %arg1[%c0, %c0_0, %c0_1] : memref<1x16x128xf32, #tpu.memory_space<vmem>>, vector<1x16x128xf32>
    %1 = vector.shape_cast %0 : vector<1x16x128xf32> to vector<16x128xf32>
    %c0_2 = arith.constant 0 : index
    %c0_3 = arith.constant 0 : index
    %2 = vector.load %arg2[%c0_2, %c0_3] : memref<16x128xf32, #tpu.memory_space<vmem>>, vector<16x128xf32>
    %c0_4 = arith.constant 0 : index
    %c0_5 = arith.constant 0 : index
    %3 = vector.load %arg3[%c0_4, %c0_5] : memref<16x128xf32, #tpu.memory_space<vmem>>, vector<16x128xf32>
    %4 = tpu.iota {dimensions = array<i32: 1>} : vector<16x128xi32>
    %c2_i32 = arith.constant 2 : i32
    %c0_i32 = arith.constant 0 : i32
    %5 = arith.cmpi eq, %c2_i32, %c0_i32 : i32
    %c1_i32 = arith.constant 1 : i32
    %6 = arith.select %5, %c1_i32, %c2_i32 : i32
    %7 = vector.broadcast %6 : i32 to vector<16x128xi32>
    %8 = arith.remsi %4, %7 : vector<16x128xi32>
    %c0_i32_6 = arith.constant 0 : i32
    %9 = vector.broadcast %c0_i32_6 : i32 to vector<16x128xi32>
    %10 = arith.cmpi ne, %8, %9 : vector<16x128xi32>
    %c0_i32_7 = arith.constant 0 : i32
    %11 = vector.broadcast %c0_i32_7 : i32 to vector<16x128xi32>
    %12 = arith.cmpi slt, %8, %11 : vector<16x128xi32>
    %c0_i32_8 = arith.constant 0 : i32
    %13 = arith.cmpi slt, %6, %c0_i32_8 : i32
    %14 = vector.broadcast %13 : i1 to vector<16x128xi1>
    %15 = vector.broadcast %14 : vector<16x128xi1> to vector<16x128xi1>
    %16 = arith.xori %12, %15 : vector<16x128xi1>
    %17 = arith.andi %16, %10 : vector<16x128xi1>
    %18 = vector.broadcast %6 : i32 to vector<16x128xi32>
    %19 = arith.addi %8, %18 : vector<16x128xi32>
    %20 = arith.select %17, %19, %8 : vector<16x128xi1>, vector<16x128xi32>
    %c0_i32_9 = arith.constant 0 : i32
    %21 = vector.broadcast %c0_i32_9 : i32 to vector<16x128xi32>
    %22 = arith.cmpi eq, %20, %21 : vector<16x128xi32>
    %c127_i32 = arith.constant 127 : i32
    %23 = tpu.dynamic_rotate %1 by %c127_i32 dim 1 : vector<16x128xf32>, i32 -> vector<16x128xf32>
    %c1_i32_10 = arith.constant 1 : i32
    %24 = tpu.dynamic_rotate %1 by %c1_i32_10 dim 1 : vector<16x128xf32>, i32 -> vector<16x128xf32>
    %25 = arith.select %22, %23, %24 : vector<16x128xi1>, vector<16x128xf32>
    %26 = arith.mulf %1, %2 : vector<16x128xf32>
    %27 = arith.mulf %25, %3 : vector<16x128xf32>
    %28 = arith.addf %26, %27 : vector<16x128xf32>
    %c0_11 = arith.constant 0 : index
    %c0_12 = arith.constant 0 : index
    %c0_13 = arith.constant 0 : index
    %29 = vector.load %arg4[%c0_11, %c0_12, %c0_13] : memref<1x16x128xf32, #tpu.memory_space<vmem>>, vector<1x16x128xf32>
    %30 = vector.shape_cast %29 : vector<1x16x128xf32> to vector<16x128xf32>
    %31 = vector.shape_cast %28 : vector<16x128xf32> to vector<1x16x128xf32>
    tpu.vector_store %arg4[%c0_11, %c0_12, %c0_13], %31 {strides = array<i32>} : memref<1x16x128xf32, #tpu.memory_space<vmem>>, vector<1x16x128xf32>,
    return
  }
  func.func @transform_0(%arg0: i32) -> (i32, i32, i32) {
    %c0_i32 = arith.constant 0 : i32
    %c0_i32_0 = arith.constant 0 : i32
    %c0_i32_1 = arith.constant 0 : i32
    return %arg0, %c0_i32, %c0_i32_0 : i32, i32, i32
  }
  func.func @transform_1(%arg0: i32) -> (i32, i32) {
    %c0_i32 = arith.constant 0 : i32
    %c0_i32_0 = arith.constant 0 : i32
    %c0_i32_1 = arith.constant 0 : i32
    return %c0_i32, %c0_i32_0 : i32, i32
  }
  func.func @transform_2(%arg0: i32) -> (i32, i32) {
    %c0_i32 = arith.constant 0 : i32
    %c0_i32_0 = arith.constant 0 : i32
    %c0_i32_1 = arith.constant 0 : i32
    return %c0_i32, %c0_i32_0 : i32, i32
  }
  func.func @transform_3(%arg0: i32) -> (i32, i32, i32) {
    %c0_i32 = arith.constant 0 : i32
    %c0_i32_0 = arith.constant 0 : i32
    %c0_i32_1 = arith.constant 0 : i32
    return %arg0, %c0_i32, %c0_i32_0 : i32, i32, i32
  }
}

module attributes {stable_mosaic.version = 11 : i64} {
  func.func @_attention_kernel(%arg0: i32, %arg1: i32, %arg2: memref<1x1x16x32xf32, #tpu.memory_space<vmem>>, %arg3: memref<1x1x16x32xf32, #tpu.memory_space<vmem>>, %arg4: memref<1x1x16x32xf32, #tpu.memory_space<vmem>>, %arg5: memref<1x1x16x32xf32, #tpu.memory_space<vmem>>) attributes {dimension_semantics = [#tpu.dimension_semantics<parallel>, #tpu.dimension_semantics<parallel>], iteration_bounds = array<i64: 2, 4>, scalar_prefetch = 0 : i64, scratch_operands = 0 : i64, tpu.core_type = #tpu.core_type<tc>, window_params = [{transform_indices = @transform_0, window_bounds = array<i64: 1, 1, 16, 32>}, {transform_indices = @transform_1, window_bounds = array<i64: 1, 1, 16, 32>}, {transform_indices = @transform_2, window_bounds = array<i64: 1, 1, 16, 32>}, {transform_indices = @transform_3, window_bounds = array<i64: 1, 1, 16, 32>}]} {
    %c0 = arith.constant 0 : index
    %c0_0 = arith.constant 0 : index
    %c0_1 = arith.constant 0 : index
    %c0_2 = arith.constant 0 : index
    %0 = vector.load %arg2[%c0, %c0_0, %c0_1, %c0_2] : memref<1x1x16x32xf32, #tpu.memory_space<vmem>>, vector<1x1x16x32xf32>
    %1 = vector.shape_cast %0 : vector<1x1x16x32xf32> to vector<16x32xf32>
    %c0_3 = arith.constant 0 : index
    %c0_4 = arith.constant 0 : index
    %c0_5 = arith.constant 0 : index
    %c0_6 = arith.constant 0 : index
    %2 = vector.load %arg3[%c0_3, %c0_4, %c0_5, %c0_6] : memref<1x1x16x32xf32, #tpu.memory_space<vmem>>, vector<1x1x16x32xf32>
    %3 = vector.shape_cast %2 : vector<1x1x16x32xf32> to vector<16x32xf32>
    %c0_7 = arith.constant 0 : index
    %c0_8 = arith.constant 0 : index
    %c0_9 = arith.constant 0 : index
    %c0_10 = arith.constant 0 : index
    %4 = vector.load %arg4[%c0_7, %c0_8, %c0_9, %c0_10] : memref<1x1x16x32xf32, #tpu.memory_space<vmem>>, vector<1x1x16x32xf32>
    %5 = vector.shape_cast %4 : vector<1x1x16x32xf32> to vector<16x32xf32>
    %cst = arith.constant dense<0.000000e+00> : vector<16x16xf32>
    %6 = tpu.matmul %1, %3, %cst {dimension_numbers = #tpu.dot_dimension_numbers<[1], [1], [0], [0], [0, 0, 1, 0], [], []>} : vector<16x32xf32>, vector<16x32xf32>, vector<16x16xf32> -> vector<16x16xf32>
    %cst_11 = arith.constant 0.176776692 : f32
    %7 = vector.broadcast %cst_11 : f32 to vector<16x16xf32>
    %8 = arith.mulf %6, %7 : vector<16x16xf32>
    %9 = tpu.iota {dimensions = array<i32: 0>} : vector<16x16xi32>
    %10 = tpu.iota {dimensions = array<i32: 1>} : vector<16x16xi32>
    %11 = arith.cmpi sle, %10, %9 : vector<16x16xi32>
    %cst_12 = arith.constant -1.000000e+30 : f32
    %12 = vector.broadcast %cst_12 : f32 to vector<16x16xf32>
    %13 = arith.select %11, %8, %12 : vector<16x16xi1>, vector<16x16xf32>
    %cst_13 = arith.constant dense<0xFF800000> : vector<16xf32>
    %14 = vector.multi_reduction <maximumf>, %13, %cst_13 [1] : vector<16x16xf32> to vector<16xf32>
    %15 = vector.shape_cast %14 : vector<16xf32> to vector<16x1xf32>
    %16 = vector.broadcast %15 : vector<16x1xf32> to vector<16x16xf32>
    %17 = arith.subf %13, %16 : vector<16x16xf32>
    %18 = math.exp %17 : vector<16x16xf32>
    %cst_14 = arith.constant dense<0.000000e+00> : vector<16xf32>
    %19 = vector.multi_reduction <add>, %18, %cst_14 [1] : vector<16x16xf32> to vector<16xf32>
    %20 = vector.shape_cast %19 : vector<16xf32> to vector<16x1xf32>
    %cst_15 = arith.constant dense<0.000000e+00> : vector<16x32xf32>
    %21 = tpu.matmul %18, %5, %cst_15 {dimension_numbers = #tpu.dot_dimension_numbers<[1], [0], [0], [1], [0, 0, 1, 1], [], []>} : vector<16x16xf32>, vector<16x32xf32>, vector<16x32xf32> -> vector<16x32xf32>
    %22 = vector.broadcast %20 : vector<16x1xf32> to vector<16x32xf32>
    %23 = arith.divf %21, %22 : vector<16x32xf32>
    %c0_16 = arith.constant 0 : index
    %c0_17 = arith.constant 0 : index
    %c0_18 = arith.constant 0 : index
    %c0_19 = arith.constant 0 : index
    %24 = vector.load %arg5[%c0_16, %c0_17, %c0_18, %c0_19] : memref<1x1x16x32xf32, #tpu.memory_space<vmem>>, vector<1x1x16x32xf32>
    %25 = vector.shape_cast %24 : vector<1x1x16x32xf32> to vector<16x32xf32>
    %26 = vector.shape_cast %23 : vector<16x32xf32> to vector<1x1x16x32xf32>
    tpu.vector_store %arg5[%c0_16, %c0_17, %c0_18, %c0_19], %26 {strides = array<i32>} : memref<1x1x16x32xf32, #tpu.memory_space<vmem>>, vector<1x1x16x32xf32>,
    return
  }
  func.func @transform_0(%arg0: i32, %arg1: i32) -> (i32, i32, i32, i32) {
    %c0_i32 = arith.constant 0 : i32
    %c0_i32_0 = arith.constant 0 : i32
    %c0_i32_1 = arith.constant 0 : i32
    return %arg0, %arg1, %c0_i32, %c0_i32_0 : i32, i32, i32, i32
  }
  func.func @transform_1(%arg0: i32, %arg1: i32) -> (i32, i32, i32, i32) {
    %c0_i32 = arith.constant 0 : i32
    %c0_i32_0 = arith.constant 0 : i32
    %c0_i32_1 = arith.constant 0 : i32
    return %arg0, %arg1, %c0_i32, %c0_i32_0 : i32, i32, i32, i32
  }
  func.func @transform_2(%arg0: i32, %arg1: i32) -> (i32, i32, i32, i32) {
    %c0_i32 = arith.constant 0 : i32
    %c0_i32_0 = arith.constant 0 : i32
    %c0_i32_1 = arith.constant 0 : i32
    return %arg0, %arg1, %c0_i32, %c0_i32_0 : i32, i32, i32, i32
  }
  func.func @transform_3(%arg0: i32, %arg1: i32) -> (i32, i32, i32, i32) {
    %c0_i32 = arith.constant 0 : i32
    %c0_i32_0 = arith.constant 0 : i32
    %c0_i32_1 = arith.constant 0 : i32
    return %arg0, %arg1, %c0_i32, %c0_i32_0 : i32, i32, i32, i32
  }
}

module attributes {stable_mosaic.version = 11 : i64} {
  func.func @_matmul_kernel(%arg0: i32, %arg1: i32, %arg2: i32, %arg3: memref<32x128xf32, #tpu.memory_space<vmem>>, %arg4: memref<128x128xf32, #tpu.memory_space<vmem>>, %arg5: memref<32x128xf32, #tpu.memory_space<vmem>>, %arg6: memref<32x128xf32, #tpu.memory_space<vmem>>) attributes {dimension_semantics = [#tpu.dimension_semantics<parallel>, #tpu.dimension_semantics<parallel>, #tpu.dimension_semantics<arbitrary>], iteration_bounds = array<i64: 1, 1, 1>, scalar_prefetch = 0 : i64, scratch_operands = 1 : i64, tpu.core_type = #tpu.core_type<tc>, window_params = [{transform_indices = @transform_0, window_bounds = array<i64: 32, 128>}, {transform_indices = @transform_1, window_bounds = array<i64: 128, 128>}, {transform_indices = @transform_2, window_bounds = array<i64: 32, 128>}]} {
    %c0_i32 = arith.constant 0 : i32
    %0 = arith.cmpi eq, %arg2, %c0_i32 : i32
    %1 = arith.extui %0 : i1 to i32
    %c0_i32_0 = arith.constant 0 : i32
    %2 = arith.cmpi ne, %1, %c0_i32_0 : i32
    scf.if %2 {
      %cst_10 = arith.constant 0.000000e+00 : f32
      %12 = vector.broadcast %cst_10 : f32 to vector<32x128xf32>
      %c0_11 = arith.constant 0 : index
      %c0_12 = arith.constant 0 : index
      %13 = vector.load %arg6[%c0_11, %c0_12] : memref<32x128xf32, #tpu.memory_space<vmem>>, vector<32x128xf32>
      tpu.vector_store %arg6[%c0_11, %c0_12], %12 {strides = array<i32>} : memref<32x128xf32, #tpu.memory_space<vmem>>, vector<32x128xf32>,
    } else {
    }
    %c0 = arith.constant 0 : index
    %c0_1 = arith.constant 0 : index
    %3 = vector.load %arg6[%c0, %c0_1] : memref<32x128xf32, #tpu.memory_space<vmem>>, vector<32x128xf32>
    %c0_2 = arith.constant 0 : index
    %c0_3 = arith.constant 0 : index
    %4 = vector.load %arg3[%c0_2, %c0_3] : memref<32x128xf32, #tpu.memory_space<vmem>>, vector<32x128xf32>
    %c0_4 = arith.constant 0 : index
    %c0_5 = arith.constant 0 : index
    %5 = vector.load %arg4[%c0_4, %c0_5] : memref<128x128xf32, #tpu.memory_space<vmem>>, vector<128x128xf32>
    %cst = arith.constant dense<0.000000e+00> : vector<32x128xf32>
    %6 = tpu.matmul %4, %5, %cst {dimension_numbers = #tpu.dot_dimension_numbers<[1], [0], [0], [1], [0, 0, 1, 1], [], []>} : vector<32x128xf32>, vector<128x128xf32>, vector<32x128xf32> -> vector<32x128xf32>
    %7 = arith.addf %3, %6 : vector<32x128xf32>
    %c0_6 = arith.constant 0 : index
    %c0_7 = arith.constant 0 : index
    %8 = vector.load %arg6[%c0_6, %c0_7] : memref<32x128xf32, #tpu.memory_space<vmem>>, vector<32x128xf32>
    tpu.vector_store %arg6[%c0_6, %c0_7], %7 {strides = array<i32>} : memref<32x128xf32, #tpu.memory_space<vmem>>, vector<32x128xf32>,
    %c0_i32_8 = arith.constant 0 : i32
    %9 = arith.cmpi eq, %arg2, %c0_i32_8 : i32
    %10 = arith.extui %9 : i1 to i32
    %c0_i32_9 = arith.constant 0 : i32
    %11 = arith.cmpi ne, %10, %c0_i32_9 : i32
    scf.if %11 {
      %c0_10 = arith.constant 0 : index
      %c0_11 = arith.constant 0 : index
      %12 = vector.load %arg6[%c0_10, %c0_11] : memref<32x128xf32, #tpu.memory_space<vmem>>, vector<32x128xf32>
      %c0_12 = arith.constant 0 : index
      %c0_13 = arith.constant 0 : index
      %13 = vector.load %arg5[%c0_12, %c0_13] : memref<32x128xf32, #tpu.memory_space<vmem>>, vector<32x128xf32>
      tpu.vector_store %arg5[%c0_12, %c0_13], %12 {strides = array<i32>} : memref<32x128xf32, #tpu.memory_space<vmem>>, vector<32x128xf32>,
    } else {
    }
    return
  }
  func.func @transform_0(%arg0: i32, %arg1: i32, %arg2: i32) -> (i32, i32) {
    %c0_i32 = arith.constant 0 : i32
    return %arg0, %arg2 : i32, i32
  }
  func.func @transform_1(%arg0: i32, %arg1: i32, %arg2: i32) -> (i32, i32) {
    %c0_i32 = arith.constant 0 : i32
    return %arg2, %arg1 : i32, i32
  }
  func.func @transform_2(%arg0: i32, %arg1: i32, %arg2: i32) -> (i32, i32) {
    %c0_i32 = arith.constant 0 : i32
    return %arg0, %arg1 : i32, i32
  }
}

module attributes {stable_mosaic.version = 11 : i64} {
  func.func @_swiglu_kernel(%arg0: i32, %arg1: memref<32x128xf32, #tpu.memory_space<vmem>>, %arg2: memref<128x256xf32, #tpu.memory_space<vmem>>, %arg3: memref<128x256xf32, #tpu.memory_space<vmem>>, %arg4: memref<256x128xf32, #tpu.memory_space<vmem>>, %arg5: memref<32x128xf32, #tpu.memory_space<vmem>>) attributes {dimension_semantics = [#tpu.dimension_semantics<parallel>], iteration_bounds = array<i64: 1>, scalar_prefetch = 0 : i64, scratch_operands = 0 : i64, tpu.core_type = #tpu.core_type<tc>, window_params = [{transform_indices = @transform_0, window_bounds = array<i64: 32, 128>}, {pipeline_mode = #tpu.pipeline_mode<synchronous>, transform_indices = @transform_1, window_bounds = array<i64: 128, 256>}, {pipeline_mode = #tpu.pipeline_mode<synchronous>, transform_indices = @transform_2, window_bounds = array<i64: 128, 256>}, {pipeline_mode = #tpu.pipeline_mode<synchronous>, transform_indices = @transform_3, window_bounds = array<i64: 256, 128>}, {transform_indices = @transform_4, window_bounds = array<i64: 32, 128>}]} {
    %c0 = arith.constant 0 : index
    %c0_0 = arith.constant 0 : index
    %0 = vector.load %arg1[%c0, %c0_0] : memref<32x128xf32, #tpu.memory_space<vmem>>, vector<32x128xf32>
    %c0_1 = arith.constant 0 : index
    %c0_2 = arith.constant 0 : index
    %1 = vector.load %arg2[%c0_1, %c0_2] : memref<128x256xf32, #tpu.memory_space<vmem>>, vector<128x256xf32>
    %cst = arith.constant dense<0.000000e+00> : vector<32x256xf32>
    %2 = tpu.matmul %0, %1, %cst {dimension_numbers = #tpu.dot_dimension_numbers<[1], [0], [0], [1], [0, 0, 1, 1], [], []>} : vector<32x128xf32>, vector<128x256xf32>, vector<32x256xf32> -> vector<32x256xf32>
    %c0_3 = arith.constant 0 : index
    %c0_4 = arith.constant 0 : index
    %3 = vector.load %arg3[%c0_3, %c0_4] : memref<128x256xf32, #tpu.memory_space<vmem>>, vector<128x256xf32>
    %cst_5 = arith.constant dense<0.000000e+00> : vector<32x256xf32>
    %4 = tpu.matmul %0, %3, %cst_5 {dimension_numbers = #tpu.dot_dimension_numbers<[1], [0], [0], [1], [0, 0, 1, 1], [], []>} : vector<32x128xf32>, vector<128x256xf32>, vector<32x256xf32> -> vector<32x256xf32>
    %cst_6 = arith.constant 0.000000e+00 : f32
    %5 = vector.broadcast %cst_6 : f32 to vector<32x256xf32>
    %6 = arith.subf %5, %2 : vector<32x256xf32>
    %7 = math.exp %6 : vector<32x256xf32>
    %cst_7 = arith.constant 1.000000e+00 : f32
    %8 = vector.broadcast %cst_7 : f32 to vector<32x256xf32>
    %9 = arith.addf %8, %7 : vector<32x256xf32>
    %cst_8 = arith.constant 1.000000e+00 : f32
    %10 = vector.broadcast %cst_8 : f32 to vector<32x256xf32>
    %11 = arith.divf %10, %9 : vector<32x256xf32>
    %12 = arith.mulf %2, %11 : vector<32x256xf32>
    %13 = arith.mulf %12, %4 : vector<32x256xf32>
    %c0_9 = arith.constant 0 : index
    %c0_10 = arith.constant 0 : index
    %14 = vector.load %arg4[%c0_9, %c0_10] : memref<256x128xf32, #tpu.memory_space<vmem>>, vector<256x128xf32>
    %cst_11 = arith.constant dense<0.000000e+00> : vector<32x128xf32>
    %15 = tpu.matmul %13, %14, %cst_11 {dimension_numbers = #tpu.dot_dimension_numbers<[1], [0], [0], [1], [0, 0, 1, 1], [], []>} : vector<32x256xf32>, vector<256x128xf32>, vector<32x128xf32> -> vector<32x128xf32>
    %c0_12 = arith.constant 0 : index
    %c0_13 = arith.constant 0 : index
    %16 = vector.load %arg5[%c0_12, %c0_13] : memref<32x128xf32, #tpu.memory_space<vmem>>, vector<32x128xf32>
    tpu.vector_store %arg5[%c0_12, %c0_13], %15 {strides = array<i32>} : memref<32x128xf32, #tpu.memory_space<vmem>>, vector<32x128xf32>,
    return
  }
  func.func @transform_0(%arg0: i32) -> (i32, i32) {
    %c0_i32 = arith.constant 0 : i32
    %c0_i32_0 = arith.constant 0 : i32
    return %arg0, %c0_i32 : i32, i32
  }
  func.func @transform_1(%arg0: i32) -> (i32, i32) {
    %c0_i32 = arith.constant 0 : i32
    %c0_i32_0 = arith.constant 0 : i32
    %c0_i32_1 = arith.constant 0 : i32
    return %c0_i32, %c0_i32_0 : i32, i32
  }
  func.func @transform_2(%arg0: i32) -> (i32, i32) {
    %c0_i32 = arith.constant 0 : i32
    %c0_i32_0 = arith.constant 0 : i32
    %c0_i32_1 = arith.constant 0 : i32
    return %c0_i32, %c0_i32_0 : i32, i32
  }
  func.func @transform_3(%arg0: i32) -> (i32, i32) {
    %c0_i32 = arith.constant 0 : i32
    %c0_i32_0 = arith.constant 0 : i32
    %c0_i32_1 = arith.constant 0 : i32
    return %c0_i32, %c0_i32_0 : i32, i32
  }
  func.func @transform_4(%arg0: i32) -> (i32, i32) {
    %c0_i32 = arith.constant 0 : i32
    %c0_i32_0 = arith.constant 0 : i32
    return %arg0, %c0_i32 : i32, i32
  }
}

module attributes {stable_mosaic.version = 11 : i64} {
  func.func @_matmul_kernel(%arg0: i32, %arg1: i32, %arg2: i32, %arg3: memref<32x128xf32, #tpu.memory_space<vmem>>, %arg4: memref<128x256xf32, #tpu.memory_space<vmem>>, %arg5: memref<32x256xf32, #tpu.memory_space<vmem>>, %arg6: memref<32x256xf32, #tpu.memory_space<vmem>>) attributes {dimension_semantics = [#tpu.dimension_semantics<parallel>, #tpu.dimension_semantics<parallel>, #tpu.dimension_semantics<arbitrary>], iteration_bounds = array<i64: 1, 1, 1>, scalar_prefetch = 0 : i64, scratch_operands = 1 : i64, tpu.core_type = #tpu.core_type<tc>, window_params = [{transform_indices = @transform_0, window_bounds = array<i64: 32, 128>}, {transform_indices = @transform_1, window_bounds = array<i64: 128, 256>}, {transform_indices = @transform_2, window_bounds = array<i64: 32, 256>}]} {
    %c0_i32 = arith.constant 0 : i32
    %0 = arith.cmpi eq, %arg2, %c0_i32 : i32
    %1 = arith.extui %0 : i1 to i32
    %c0_i32_0 = arith.constant 0 : i32
    %2 = arith.cmpi ne, %1, %c0_i32_0 : i32
    scf.if %2 {
      %cst_10 = arith.constant 0.000000e+00 : f32
      %12 = vector.broadcast %cst_10 : f32 to vector<32x256xf32>
      %c0_11 = arith.constant 0 : index
      %c0_12 = arith.constant 0 : index
      %13 = vector.load %arg6[%c0_11, %c0_12] : memref<32x256xf32, #tpu.memory_space<vmem>>, vector<32x256xf32>
      tpu.vector_store %arg6[%c0_11, %c0_12], %12 {strides = array<i32>} : memref<32x256xf32, #tpu.memory_space<vmem>>, vector<32x256xf32>,
    } else {
    }
    %c0 = arith.constant 0 : index
    %c0_1 = arith.constant 0 : index
    %3 = vector.load %arg6[%c0, %c0_1] : memref<32x256xf32, #tpu.memory_space<vmem>>, vector<32x256xf32>
    %c0_2 = arith.constant 0 : index
    %c0_3 = arith.constant 0 : index
    %4 = vector.load %arg3[%c0_2, %c0_3] : memref<32x128xf32, #tpu.memory_space<vmem>>, vector<32x128xf32>
    %c0_4 = arith.constant 0 : index
    %c0_5 = arith.constant 0 : index
    %5 = vector.load %arg4[%c0_4, %c0_5] : memref<128x256xf32, #tpu.memory_space<vmem>>, vector<128x256xf32>
    %cst = arith.constant dense<0.000000e+00> : vector<32x256xf32>
    %6 = tpu.matmul %4, %5, %cst {dimension_numbers = #tpu.dot_dimension_numbers<[1], [0], [0], [1], [0, 0, 1, 1], [], []>} : vector<32x128xf32>, vector<128x256xf32>, vector<32x256xf32> -> vector<32x256xf32>
    %7 = arith.addf %3, %6 : vector<32x256xf32>
    %c0_6 = arith.constant 0 : index
    %c0_7 = arith.constant 0 : index
    %8 = vector.load %arg6[%c0_6, %c0_7] : memref<32x256xf32, #tpu.memory_space<vmem>>, vector<32x256xf32>
    tpu.vector_store %arg6[%c0_6, %c0_7], %7 {strides = array<i32>} : memref<32x256xf32, #tpu.memory_space<vmem>>, vector<32x256xf32>,
    %c0_i32_8 = arith.constant 0 : i32
    %9 = arith.cmpi eq, %arg2, %c0_i32_8 : i32
    %10 = arith.extui %9 : i1 to i32
    %c0_i32_9 = arith.constant 0 : i32
    %11 = arith.cmpi ne, %10, %c0_i32_9 : i32
    scf.if %11 {
      %c0_10 = arith.constant 0 : index
      %c0_11 = arith.constant 0 : index
      %12 = vector.load %arg6[%c0_10, %c0_11] : memref<32x256xf32, #tpu.memory_space<vmem>>, vector<32x256xf32>
      %c0_12 = arith.constant 0 : index
      %c0_13 = arith.constant 0 : index
      %13 = vector.load %arg5[%c0_12, %c0_13] : memref<32x256xf32, #tpu.memory_space<vmem>>, vector<32x256xf32>
      tpu.vector_store %arg5[%c0_12, %c0_13], %12 {strides = array<i32>} : memref<32x256xf32, #tpu.memory_space<vmem>>, vector<32x256xf32>,
    } else {
    }
    return
  }
  func.func @transform_0(%arg0: i32, %arg1: i32, %arg2: i32) -> (i32, i32) {
    %c0_i32 = arith.constant 0 : i32
    return %arg0, %arg2 : i32, i32
  }
  func.func @transform_1(%arg0: i32, %arg1: i32, %arg2: i32) -> (i32, i32) {
    %c0_i32 = arith.constant 0 : i32
    return %arg2, %arg1 : i32, i32
  }
  func.func @transform_2(%arg0: i32, %arg1: i32, %arg2: i32) -> (i32, i32) {
    %c0_i32 = arith.constant 0 : i32
    return %arg0, %arg1 : i32, i32
  }
}

</mosaic_0001>

<bundles_post_ra>
// kernel: tile.15
= control target key start
LH: loop header
LB: loop body
LE: loop exit
PB: predicated region body
PF: predicated region fallthrough
CT: control target
= control target key end

     0   :  { %vm82_vm0 = vcmask 1047556   ;;  %vm84_vm1 = vcmask 261120   ;;  %s195_s9 = smov 96   ;;  %s196_s14 = smov 32   ;;  %vm103_vm2 = vcmask 1048320   ;;  %vm124_vm3 = vcmask 785920   ;;  %s289_s0 = inlined_call_operand.vmem [shape: f32[16,4,32], index: 0, kind: input, shape index: {}]   ;;  %s290_s1 = inlined_call_operand.vmem [shape: f32[16,128], index: 1, kind: output, shape index: {}]  }
   0x1   :  { %v180_v0 = vld [vmem:[%s289_s0 + $0x1c] sm:$0xf]  ;;  %v181_v1 = vld [vmem:[%s289_s0 + $0x18] sm:$0xf]  ;;  %v182_v2 = vld [vmem:[%s289_s0 + $0x14] sm:$0xf] }
   0x2   :  { %48 = vst [vmem:[#allocation0 + $0x38] sm:$0xf] %v180_v0  ;;  %53 = vst [vmem:[#allocation0 + $0x30] sm:$0xf] %v181_v1  ;;  %v183_v3 = vld [vmem:[%s289_s0 + $0x10] sm:$0xf] }
   0x3   :  { %58 = vst [vmem:[#allocation0 + $0x28] sm:$0xf] %v182_v2  ;;  %v184_v4 = vld [vmem:[%s289_s0 + $0xc] sm:$0xf]  ;;  %v185_v5 = vld [vmem:[%s289_s0 + $0x8] sm:$0xf] }
   0x4   :  { %63 = vst [vmem:[#allocation0 + $0x20] sm:$0xf] %v183_v3  ;;  %68 = vst [vmem:[#allocation0 + $0x18] sm:$0xf] %v184_v4  ;;  %v186_v6 = vld [vmem:[%s289_s0 + $0x4] sm:$0xf] }
   0x5   :  { %73 = vst [vmem:[#allocation0 + $0x10] sm:$0xf] %v185_v5  ;;  %v78_v7 = vld [vmem:[%s289_s0] sm:$0xf]  ;;  %77 = vst [vmem:[#allocation0 + $0x8] sm:$0xf] %v186_v6 }
   0x6   :  { %79 = vst [vmem:[#allocation0] sm:$0xf] %v78_v7  ;;  %v172_v8 = vld [vmem:[%s289_s0 + $0x3c] sm:$0xf]  ;;  %v173_v9 = vld [vmem:[%s289_s0 + $0x38] sm:$0xf] }
   0x7   :  { %8 = vst [vmem:[#allocation0 + $0x78] sm:$0xf] %v172_v8  ;;  %13 = vst [vmem:[#allocation0 + $0x70] sm:$0xf] %v173_v9  ;;  %v174_v10 = vld [vmem:[%s289_s0 + $0x34] sm:$0xf] }
   0x8   :  { %v175_v11 = vld [vmem:[%s289_s0 + $0x30] sm:$0xf]  ;;  %v176_v12 = vld [vmem:[%s289_s0 + $0x2c] sm:$0xf]  ;;  %18 = vst [vmem:[#allocation0 + $0x68] sm:$0xf] %v174_v10 }
   0x9   :  { %23 = vst [vmem:[#allocation0 + $0x60] sm:$0xf] %v175_v11  ;;  %28 = vst [vmem:[#allocation0 + $0x58] sm:$0xf] %v176_v12  ;;  %v177_v13 = vld [vmem:[%s289_s0 + $0x28] sm:$0xf] }
   0xa   :  { %v178_v14 = vld [vmem:[%s289_s0 + $0x24] sm:$0xf]  ;;  %v179_v15 = vld [vmem:[%s289_s0 + $0x20] sm:$0xf]  ;;  %33 = vst [vmem:[#allocation0 + $0x50] sm:$0xf] %v177_v13 }
   0xb   :  { %38 = vst [vmem:[#allocation0 + $0x48] sm:$0xf] %v178_v14  ;;  %43 = vst [vmem:[#allocation0 + $0x40] sm:$0xf] %v179_v15  ;;  %s194_s0 = smov 64   ;;  %vm145_vm4 = vcmask 523520  }
   0xc   :  { %v119_v16 = vld [vmem:[#allocation0 + $0x2] ss:$8 sm:$0xf0]   ;;  %v98_v17 = vld [vmem:[#allocation0 + $0x3] ss:$8 sm:$0xf0]  }
   0xd   :  { %v117_v18 = vld [vmem:[#allocation0 + $0x2] ss:$8 sm:$0xf]   ;;  %v96_v19 = vld [vmem:[#allocation0 + $0x3] ss:$8 sm:$0xf]  }
   0xe   :  { %v121_v20 = vsel %vm82_vm0, %v119_v16, %v117_v18  ;;  %v100_v21 = vsel %vm82_vm0, %v98_v17, %v96_v19  ;;  %v138_v24 = vld [vmem:[#allocation0 + $0x1] ss:$8 sm:$0xf]   ;;  %v80_v32 = vld [vmem:[#allocation0] ss:$8 sm:$0xf]  }
   0xf   :  { %122 = vrot.lane.b32.xlu1 %v121_v20, %s194_s0  ;;  %101 = vrot.lane.b32.xlu0 %v100_v21, %s195_s9  ;;  %v140_v25 = vld [vmem:[#allocation0 + $0x1] ss:$8 sm:$0xf0]   ;;  %v81_v33 = vld [vmem:[#allocation0] ss:$8 sm:$0xf0]  }
  0x10   :  { %v129_v22 = vld [vmem:[#allocation0 + $0x42] ss:$8 sm:$0xf0]   ;;  %v108_v23 = vld [vmem:[#allocation0 + $0x43] ss:$8 sm:$0xf0]   ;;  %v83_v34 = vsel %vm82_vm0, %v81_v33, %v80_v32  ;;  %v142_v38 = vsel %vm82_vm0, %v140_v25, %v138_v24 }
  0x11   :  { %v150_v31 = vld [vmem:[#allocation0 + $0x41] ss:$8 sm:$0xf0]   ;;  %v89_v36 = vld [vmem:[#allocation0 + $0x40] ss:$8 sm:$0xf0]  }
  0x12   :  { %v127_v26 = vld [vmem:[#allocation0 + $0x42] ss:$8 sm:$0xf]   ;;  %v106_v27 = vld [vmem:[#allocation0 + $0x43] ss:$8 sm:$0xf]  }
  0x13   :  { %v131_v28 = vsel %vm82_vm0, %v129_v22, %v127_v26  ;;  %v110_v29 = vsel %vm82_vm0, %v108_v23, %v106_v27  ;;  %v148_v30 = vld [vmem:[#allocation0 + $0x41] ss:$8 sm:$0xf]   ;;  %v87_v35 = vld [vmem:[#allocation0 + $0x40] ss:$8 sm:$0xf]  }
  0x14   :  { %132 = vrot.lane.b32.xlu1 %v131_v28, %s194_s0  ;;  %111 = vrot.lane.b32.xlu0 %v110_v29, %s195_s9  ;;  %v152_v37 = vsel %vm82_vm0, %v150_v31, %v148_v30  ;;  %85 = vst.msk [vmem:[%s290_s1] sm:$0xff] %vm84_vm1, %v83_v34   ;;  %v91_v39 = vsel %vm82_vm0, %v89_v36, %v87_v35 }
  0x15   :  { %187 = vst.msk [vmem:[%s290_s1 + $0x8] sm:$0xff] %vm84_vm1, %v91_v39  }
  0x18   :  { %153 = vrot.lane.b32.xlu1 %v152_v37, %s196_s14  ;;  %143 = vrot.lane.b32.xlu0 %v142_v38, %s196_s14 }
  0x81   :  { %v123_v40 = vpop.permute.xlu1 %122   ;;  %v102_v41 = vpop.permute.xlu0 %101  }
  0x82   :  { %104 = vst.msk [vmem:[%s290_s1] sm:$0xff] %vm103_vm2, %v102_v41  }
  0x83   :  { %125 = vst.msk [vmem:[%s290_s1] sm:$0xff] %vm124_vm3, %v123_v40  }
  0x86   :  { %v133_v42 = vpop.permute.xlu1 %132   ;;  %v112_v43 = vpop.permute.xlu0 %111  }
  0x87   :  { %188 = vst.msk [vmem:[%s290_s1 + $0x8] sm:$0xff] %vm103_vm2, %v112_v43  }
  0x88   :  { %189 = vst.msk [vmem:[%s290_s1 + $0x8] sm:$0xff] %vm124_vm3, %v133_v42  }
  0x8a   :  { %v154_v44 = vpop.permute.xlu1 %153   ;;  %v144_v45 = vpop.permute.xlu0 %143  }
  0x8b   :  { %190 = vst.msk [vmem:[%s290_s1 + $0x8] sm:$0xff] %vm145_vm4, %v154_v44   ;;  %146 = vst.msk [vmem:[%s290_s1] sm:$0xff] %vm145_vm4, %v144_v45  }

// kernel: transformer_lm_forward.18
= control target key start
LH: loop header
LB: loop body
LE: loop exit
PB: predicated region body
PF: predicated region fallthrough
CT: control target
= control target key end

     0   :  { %v119_v3 = vmov 0   ;;  %s182_s1 = inlined_call_operand.vmem [shape: f32[32,128], index: 1, kind: input, shape index: {}]   ;;  %s183_s0 = inlined_call_operand.<no memory space> [shape: f32[1,1], index: 0, kind: input, shape index: {}]   ;;  %s184_s2 = inlined_call_operand.vmem [shape: f32[32,128], index: 2, kind: output, shape index: {}]  }
   0x1   :  { %v138_v0 = vld [vmem:[%s182_s1 + $0x10] sm:$0xff]  ;;  %v143_v1 = vld [vmem:[%s182_s1] sm:$0xff]  ;;  %v148_v2 = vld [vmem:[%s182_s1 + $0x18] sm:$0xff]  ;;  %102 = vset.pattern.permute.xlu0 %v119_v3  ;;  %v7_v4 = vstv %s183_s0 }
   0x2   :  { %v19_v5 = vmul.f32 %v138_v0, %v138_v0  ;;  %v17_v6 = vmul.f32 %v143_v1, %v143_v1  ;;  %v160_v7 = vld [vmem:[%s182_s1 + $0x8] sm:$0xff]  ;;  %8 = vst [vmem:[#allocation2] sm:$0x1] %v7_v4  ;;  %v20_v8 = vmul.f32 %v148_v2, %v148_v2 }
   0x3   :  { %v18_v9 = vmul.f32 %v160_v7, %v160_v7 }
   0x4   :  { %25 = vadd.xlane.f32.xlu1 %v19_v5  ;;  %21 = vadd.xlane.f32.xlu0 %v17_v6 }
   0x8   :  { %27 = vadd.xlane.f32.xlu1 %v20_v8  ;;  %23 = vadd.xlane.f32.xlu0 %v18_v9 }
   0x9   :  { %v100_v10 = vld [vmem:[#allocation2] ss:$0 sm:$0xff] }
  0x1e   :  { %85 = vperm.xlu0 %102, %v100_v10  }
  0x91   :  { %v26_v11 = vpop.xlane.xlu1 %25  ;;  %v22_v12 = vpop.xlane.xlu0 %21 }
  0x92   :  { %v32_v13 = vmul.f32 0.0078125, %v26_v11  ;;  %v30_v14 = vmul.f32 0.0078125, %v22_v12 }
  0x94   :  { %v36_v15 = vadd.f32 1e-05, %v32_v13  ;;  %v34_v16 = vadd.f32 1e-05, %v30_v14 }
  0x95   :  { %v28_v17 = vpop.xlane.xlu1 %27  ;;  %v24_v18 = vpop.xlane.xlu0 %23 }
  0x96   :  { %103 = vrsqrt.f32 %v36_v15  ;;  %v33_v19 = vmul.f32 0.0078125, %v28_v17  ;;  %v31_v20 = vmul.f32 0.0078125, %v24_v18  ;;  %vm54_vm0 = vcmp.eq.f32.partialorder %v36_v15, inf }
  0x97   :  { %105 = vrsqrt.f32 %v34_v16  ;;  %v57_v26 = vand.u32 2147483648, %v36_v15  ;;  %vm40_vm1 = vcmp.eq.f32.partialorder %v34_v16, inf  ;;  %v43_v28 = vand.u32 2147483648, %v34_v16 }
  0x98   :  { %v37_v21 = vadd.f32 1e-05, %v33_v19  ;;  %v35_v22 = vadd.f32 1e-05, %v31_v20  ;;  %vm56_vm2 = vcmp.eq.f32.partialorder %v36_v15, 0.0  ;;  %vm42_vm3 = vcmp.eq.f32.partialorder %v34_v16, 0.0 }
  0x9a   :  { %107 = vrsqrt.f32 %v37_v21  ;;  %vm61_vm4 = vcmp.eq.f32.partialorder %v37_v21, inf  ;;  %v64_v36 = vand.u32 2147483648, %v37_v21  ;;  %vm63_vm5 = vcmp.eq.f32.partialorder %v37_v21, 0.0 }
  0x9b   :  { %109 = vrsqrt.f32 %v35_v22  ;;  %vm47_vm6 = vcmp.eq.f32.partialorder %v35_v22, inf  ;;  %v50_v39 = vand.u32 2147483648, %v35_v22  ;;  %vm49_vm7 = vcmp.eq.f32.partialorder %v35_v22, 0.0 }
  0x9d   :  { %v86_v44 = vpop.permute.xlu0 %85 }
  0xa0   :  { %v104_v23 = vpop.eup %103 }
  0xa1   :  { %v106_v24 = vpop.eup %105  ;;  %v53_v25 = vmul.f32 %v104_v23, %v36_v15 }
  0xa2   :  { %v39_v27 = vmul.f32 %v106_v24, %v34_v16 }
  0xa3   :  { %v55_v29 = vsel %vm54_vm0, %v36_v15, %v53_v25 }
  0xa4   :  { %v41_v30 = vsel %vm40_vm1, %v34_v16, %v39_v27  ;;  %v58_v31 = vsel %vm56_vm2, %v57_v26, %v55_v29  ;;  %v108_v32 = vpop.eup %107 }
  0xa5   :  { %v44_v33 = vsel %vm42_vm3, %v43_v28, %v41_v30  ;;  %111 = vrcp.f32 %v58_v31  ;;  %v110_v34 = vpop.eup %109  ;;  %v60_v35 = vmul.f32 %v108_v32, %v37_v21 }
  0xa6   :  { %113 = vrcp.f32 %v44_v33  ;;  %v46_v37 = vmul.f32 %v110_v34, %v35_v22 }
  0xa7   :  { %v62_v38 = vsel %vm61_vm4, %v37_v21, %v60_v35 }
  0xa8   :  { %v48_v40 = vsel %vm47_vm6, %v35_v22, %v46_v37  ;;  %v65_v41 = vsel %vm63_vm5, %v64_v36, %v62_v38 }
  0xa9   :  { %v51_v42 = vsel %vm49_vm7, %v50_v39, %v48_v40  ;;  %115 = vrcp.f32 %v65_v41 }
  0xaa   :  { %117 = vrcp.f32 %v51_v42 }
  0xaf   :  { %v112_v43 = vpop.eup %111 }
  0xb0   :  { %v114_v45 = vpop.eup %113  ;;  %v77_v46 = vmul.f32 %v112_v43, %v138_v0 }
  0xb1   :  { %v75_v47 = vmul.f32 %v114_v45, %v143_v1 }
  0xb2   :  { %v90_v48 = vmul.f32 %v86_v44, %v77_v46 }
  0xb3   :  { %v88_v49 = vmul.f32 %v86_v44, %v75_v47  ;;  %v116_v50 = vpop.eup %115 }
  0xb4   :  { %94 = vst [vmem:[%s184_s2 + $0x10] sm:$0xff] %v90_v48  ;;  %v118_v51 = vpop.eup %117  ;;  %v78_v52 = vmul.f32 %v116_v50, %v148_v2 }
  0xb5   :  { %92 = vst [vmem:[%s184_s2] sm:$0xff] %v88_v49  ;;  %v76_v53 = vmul.f32 %v118_v51, %v160_v7 }
  0xb6   :  { %v91_v54 = vmul.f32 %v86_v44, %v78_v52 }
  0xb7   :  { %v89_v55 = vmul.f32 %v86_v44, %v76_v53 }
  0xb8   :  { %95 = vst [vmem:[%s184_s2 + $0x18] sm:$0xff] %v91_v54 }
  0xb9   :  { %93 = vst [vmem:[%s184_s2 + $0x8] sm:$0xff] %v89_v55 }

// kernel: transformer_lm_forward.19
= control target key start
LH: loop header
LB: loop body
LE: loop exit
PB: predicated region body
PF: predicated region fallthrough
CT: control target
= control target key end

     0   :  { %v443_v3 = vmov 0.0   ;;  %s655_s1 = inlined_call_operand.vmem [shape: f32[128,384], index: 1, kind: input, shape index: {}]   ;;  %s656_s0 = inlined_call_operand.vmem [shape: f32[32,128], index: 0, kind: input, shape index: {}]   ;;  %s657_s2 = inlined_call_operand.vmem [shape: f32[32,384], index: 2, kind: output, shape index: {}]  }
   0x1   :  { %v44_v0 = vld [vmem:[%s655_s1 + $0x8] sm:$0xff]  ;;  %v47_v1 = vld [vmem:[%s655_s1 + $0x20] sm:$0xff]  ;;  %155 = vmatprep.mubr.f32.mxu0 %v443_v3  ;;  %v46_v5 = vld [vmem:[%s655_s1 + $0x18] sm:$0xff] }
   0x2   :  { %v43_v2 = vld [vmem:[%s655_s1] sm:$0xff]  ;;  %v378_v4 = vpack.c.bf16 %v47_v1, %v44_v0  ;;  %v50_v6 = vld [vmem:[%s655_s1 + $0x38] sm:$0xff]  ;;  %v53_v7 = vld [vmem:[%s655_s1 + $0x50] sm:$0xff] }
   0x3   :  { %v380_v8 = vpack.c.bf16 %v46_v5, %v43_v2  ;;  %v382_v9 = vpack.c.bf16 %v53_v7, %v50_v6  ;;  %v49_v10 = vld [vmem:[%s655_s1 + $0x30] sm:$0xff]  ;;  %v52_v11 = vld [vmem:[%s655_s1 + $0x48] sm:$0xff]  ;;  %v59_v15 = vld [vmem:[%s655_s1 + $0x80] sm:$0xff] }
   0x4   :  { %v45_v12 = vld [vmem:[%s655_s1 + $0x10] sm:$0xff]  ;;  %379 = vmatprep.subr.bf16.mxu0 %v378_v4  ;;  %v48_v13 = vld [vmem:[%s655_s1 + $0x28] sm:$0xff]  ;;  %v384_v16 = vpack.c.bf16 %v52_v11, %v49_v10  ;;  %v51_v18 = vld [vmem:[%s655_s1 + $0x40] sm:$0xff] }
   0x5   :  { %v56_v14 = vld [vmem:[%s655_s1 + $0x68] sm:$0xff]  ;;  %381 = vmatpush1.bf16.msra.mxu0 %v380_v8  ;;  %v410_v17 = vpack.c.bf16 %v48_v13, %v45_v12  ;;  %v55_v20 = vld [vmem:[%s655_s1 + $0x60] sm:$0xff]  ;;  %v58_v21 = vld [vmem:[%s655_s1 + $0x78] sm:$0xff] }
   0x6   :  { %383 = vmatprep.subr.bf16.mxu0 %v382_v9  ;;  %v386_v19 = vpack.c.bf16 %v59_v15, %v56_v14  ;;  %v54_v22 = vld [vmem:[%s655_s1 + $0x58] sm:$0xff]  ;;  %v65_v25 = vld [vmem:[%s655_s1 + $0xb0] sm:$0xff]  ;;  %v60_v27 = vld [vmem:[%s655_s1 + $0x88] sm:$0xff]  ;;  %v388_v28 = vpack.c.bf16 %v58_v21, %v55_v20 }
   0x7   :  { %411 = vmatprep.subr.bf16.mxu1 %v410_v17  ;;  %v414_v23 = vpack.c.bf16 %v54_v22, %v51_v18  ;;  %v62_v24 = vld [vmem:[%s655_s1 + $0x98] sm:$0xff]  ;;  %v57_v26 = vld [vmem:[%s655_s1 + $0x70] sm:$0xff]  ;;  %v64_v32 = vld [vmem:[%s655_s1 + $0xa8] sm:$0xff] }
   0x8   :  { %413 = vmatpush3.bf16.msra.mxu1 %v410_v17  ;;  %v61_v29 = vld [vmem:[%s655_s1 + $0x90] sm:$0xff]  ;;  %v418_v30 = vpack.c.bf16 %v60_v27, %v57_v26  ;;  %v390_v31 = vpack.c.bf16 %v65_v25, %v62_v24  ;;  %v63_v33 = vld [vmem:[%s655_s1 + $0xa0] sm:$0xff]  ;;  %v66_v34 = vld [vmem:[%s655_s1 + $0xb8] sm:$0xff] }
   0x9   :  { %385 = vmatpush1.bf16.msra.mxu0 %v384_v16  ;;  %415 = vmatprep.subr.bf16.mxu1 %v414_v23  ;;  %v68_v35 = vld [vmem:[%s655_s1 + $0xc8] sm:$0xff]  ;;  %v71_v36 = vld [vmem:[%s655_s1 + $0xe0] sm:$0xff]  ;;  %v392_v37 = vpack.c.bf16 %v64_v32, %v61_v29  ;;  %v422_v39 = vpack.c.bf16 %v66_v34, %v63_v33  ;;  %v70_v41 = vld [vmem:[%s655_s1 + $0xd8] sm:$0xff] }
   0xa   :  { %387 = vmatprep.subr.bf16.mxu0 %v386_v19  ;;  %v67_v38 = vld [vmem:[%s655_s1 + $0xc0] sm:$0xff]  ;;  %v394_v40 = vpack.c.bf16 %v71_v36, %v68_v35  ;;  %v69_v42 = vld [vmem:[%s655_s1 + $0xd0] sm:$0xff]  ;;  %v72_v43 = vld [vmem:[%s655_s1 + $0xe8] sm:$0xff] }
   0xb   :  { %v74_v44 = vld [vmem:[%s655_s1 + $0xf8] sm:$0xff]  ;;  %v77_v45 = vld [vmem:[%s655_s1 + $0x110] sm:$0xff]  ;;  %v396_v46 = vpack.c.bf16 %v70_v41, %v67_v38  ;;  %v426_v48 = vpack.c.bf16 %v72_v43, %v69_v42  ;;  %v39_v49 = vld [vmem:[%s656_s0] sm:$0xff] }
   0xc   :  { %417 = vmatpush3.bf16.msra.mxu1 %v414_v23  ;;  %v73_v47 = vld [vmem:[%s655_s1 + $0xf0] sm:$0xff]  ;;  %v398_v50 = vpack.c.bf16 %v77_v45, %v74_v44  ;;  %v76_v51 = vld [vmem:[%s655_s1 + $0x108] sm:$0xff]  ;;  %v75_v52 = vld [vmem:[%s655_s1 + $0x100] sm:$0xff]  ;;  %372 = vmatprep.mubr.f32.mxu1 %v39_v49 }
   0xd   :  { %389 = vmatpush1.bf16.msra.mxu0 %v388_v28  ;;  %419 = vmatprep.subr.bf16.mxu1 %v418_v30  ;;  %v78_v53 = vld [vmem:[%s655_s1 + $0x118] sm:$0xff]  ;;  %v80_v54 = vld [vmem:[%s655_s1 + $0x128] sm:$0xff]  ;;  %v83_v55 = vld [vmem:[%s655_s1 + $0x140] sm:$0xff]  ;;  %v400_v56 = vpack.c.bf16 %v76_v51, %v73_v47 }
   0xe   :  { %391 = vmatprep.subr.bf16.mxu0 %v390_v31  ;;  %v79_v57 = vld [vmem:[%s655_s1 + $0x120] sm:$0xff]  ;;  %v430_v58 = vpack.c.bf16 %v78_v53, %v75_v52  ;;  %v402_v59 = vpack.c.bf16 %v83_v55, %v80_v54  ;;  %v82_v60 = vld [vmem:[%s655_s1 + $0x138] sm:$0xff]  ;;  %v81_v61 = vld [vmem:[%s655_s1 + $0x130] sm:$0xff] }
   0xf   :  { %v84_v62 = vld [vmem:[%s655_s1 + $0x148] sm:$0xff]  ;;  %v86_v63 = vld [vmem:[%s655_s1 + $0x158] sm:$0xff]  ;;  %v89_v0 = vld [vmem:[%s655_s1 + $0x170] sm:$0xff]  ;;  %v404_v1 = vpack.c.bf16 %v82_v60, %v79_v57 }
  0x10   :  { %421 = vmatpush3.bf16.msra.mxu1 %v418_v30  ;;  %v85_v2 = vld [vmem:[%s655_s1 + $0x150] sm:$0xff]  ;;  %v434_v4 = vpack.c.bf16 %v84_v62, %v81_v61  ;;  %v406_v5 = vpack.c.bf16 %v89_v0, %v86_v63  ;;  %v88_v6 = vld [vmem:[%s655_s1 + $0x168] sm:$0xff]  ;;  %v87_v7 = vld [vmem:[%s655_s1 + $0x160] sm:$0xff] }
  0x11   :  { %393 = vmatpush1.bf16.msra.mxu0 %v392_v37  ;;  %423 = vmatprep.subr.bf16.mxu1 %v422_v39  ;;  %v90_v8 = vld [vmem:[%s655_s1 + $0x178] sm:$0xff]  ;;  %v408_v9 = vpack.c.bf16 %v88_v6, %v85_v2  ;;  %v40_v11 = vld [vmem:[%s656_s0 + $0x8] sm:$0xff]  ;;  %v41_v12 = vld [vmem:[%s656_s0 + $0x10] sm:$0xff] }
  0x12   :  { %395 = vmatprep.subr.bf16.mxu0 %v394_v40  ;;  %v438_v10 = vpack.c.bf16 %v90_v8, %v87_v7  ;;  %v42_v13 = vld [vmem:[%s656_s0 + $0x18] sm:$0xff] }
  0x14   :  { %425 = vmatpush3.bf16.msra.mxu1 %v422_v39 }
  0x15   :  { %397 = vmatpush1.bf16.msra.mxu0 %v396_v46  ;;  %427 = vmatprep.subr.bf16.mxu1 %v426_v48 }
  0x16   :  { %399 = vmatprep.subr.bf16.mxu0 %v398_v50 }
  0x18   :  { %429 = vmatpush3.bf16.msra.mxu1 %v426_v48 }
  0x19   :  { %401 = vmatpush1.bf16.msra.mxu0 %v400_v56  ;;  %431 = vmatprep.subr.bf16.mxu1 %v430_v58 }
  0x1a   :  { %403 = vmatprep.subr.bf16.mxu0 %v402_v59 }
  0x1c   :  { %433 = vmatpush3.bf16.msra.mxu1 %v430_v58 }
  0x1d   :  { %405 = vmatpush1.bf16.msra.mxu0 %v404_v1  ;;  %435 = vmatprep.subr.bf16.mxu1 %v434_v4 }
  0x1e   :  { %407 = vmatprep.subr.bf16.mxu0 %v406_v5 }
  0x20   :  { %437 = vmatpush3.bf16.msra.mxu1 %v434_v4 }
  0x21   :  { %409 = vmatpush1.bf16.msra.mxu0 %v408_v9  ;;  %439 = vmatprep.subr.bf16.mxu1 %v438_v10 }
  0x24   :  { %156 = vmatmul.mubr.f32.vlgmr.msra.gmra.mrb[0].mxu0 %v39_v49  ;;  %441 = vmatpush3.bf16.msra.mxu1 %v438_v10 }
  0x25   :  { %161 = vmatprep.mubr.f32.mxu0 %v443_v3 }
  0x27   :  { %373 = vmatmul.mubr.f32.vlgmr.msra.gmra.mrb[0].mxu1 %v40_v11 }
  0x28   :  { %162 = vmatmul.mubr.f32.gmra.mrb[2].mxu0 %v40_v11  ;;  %375 = vmatprep.mubr.f32.mxu1 %v41_v12 }
  0x29   :  { %167 = vmatprep.mubr.f32.mxu0 %v443_v3 }
  0x2b   :  { %376 = vmatmul.mubr.f32.gmra.mrb[2].mxu1 %v42_v13 }
  0x2c   :  { %168 = vmatmul.mubr.f32.gmra.mrb[4].mxu0 %v41_v12 }
  0x2d   :  { %173 = vmatprep.mubr.f32.mxu0 %v443_v3 }
  0x30   :  { %174 = vmatmul.mubr.f32.gmra.mrb[6].mxu0 %v42_v13 }
  0xf7   :  { %v157_v14 = vpop.f32.mrb[0].mxu0 }
  0xf8   :  { %304 = vst [vmem:[%s657_s2] sm:$0xff] %v157_v14  ;;  %v159_v15 = vpop.f32.mrb[1].mxu0 }
  0xf9   :  { %305 = vst [vmem:[%s657_s2 + $0x8] sm:$0xff] %v159_v15 }
  0xfa   :  { %v374_v16 = vpop.f32.mrb[0].mxu1 }
  0xfb   :  { %v163_v17 = vpop.f32.mrb[2].mxu0  ;;  %309 = vst [vmem:[%s657_s2 + $0x28] sm:$0xff] %v374_v16  ;;  %v246_v18 = vpop.f32.mrb[1].mxu1 }
  0xfc   :  { %307 = vst [vmem:[%s657_s2 + $0x18] sm:$0xff] %v163_v17  ;;  %v165_v3 = vpop.f32.mrb[3].mxu0  ;;  %306 = vst [vmem:[%s657_s2 + $0x10] sm:$0xff] %v246_v18 }
  0xfd   :  { %308 = vst [vmem:[%s657_s2 + $0x20] sm:$0xff] %v165_v3 }
  0xfe   :  { %v377_v19 = vpop.f32.mrb[2].mxu1 }
  0xff   :  { %v169_v20 = vpop.f32.mrb[4].mxu0  ;;  %315 = vst [vmem:[%s657_s2 + $0x58] sm:$0xff] %v377_v19  ;;  %v256_v21 = vpop.f32.mrb[3].mxu1 }
 0x100   :  { %310 = vst [vmem:[%s657_s2 + $0x30] sm:$0xff] %v169_v20  ;;  %v171_v22 = vpop.f32.mrb[5].mxu0  ;;  %312 = vst [vmem:[%s657_s2 + $0x40] sm:$0xff] %v256_v21 }
 0x101   :  { %311 = vst [vmem:[%s657_s2 + $0x38] sm:$0xff] %v171_v22 }
 0x103   :  { %v175_v23 = vpop.f32.mrb[6].mxu0 }
 0x104   :  { %313 = vst [vmem:[%s657_s2 + $0x48] sm:$0xff] %v175_v23  ;;  %v177_v24 = vpop.f32.mrb[7].mxu0 }
 0x105   :  { %314 = vst [vmem:[%s657_s2 + $0x50] sm:$0xff] %v177_v24 }

// kernel: transformer_lm_forward.21
= control target key start
LH: loop header
LB: loop body
LE: loop exit
PB: predicated region body
PF: predicated region fallthrough
CT: control target
= control target key end

     0   :  { %s318_s12 = smov 0   ;;  %s355_s0 = inlined_call_operand.vmem [shape: f32[2,16,128], index: 0, kind: input, shape index: {}]   ;;  %s356_s1 = inlined_call_operand.vmem [shape: f32[16,128], index: 1, kind: input, shape index: {}]   ;;  %s357_s2 = inlined_call_operand.vmem [shape: f32[16,128], index: 2, kind: input, shape index: {}]   ;;  %s358_s3 = inlined_call_operand.vmem [shape: f32[2,16,128], index: 3, kind: output, shape index: {}]  }
   0x1 LB: > { %s265_s13 = sadd.s32 4294967295, %s294_s12   ;;  %p269_p0 = scmp.ge.s32.totalorder %s294_s12, 1  ;;  %s294_s12 = sphi %s318_s12, %s13_s12  }
   0x2   : > { %p137_p1 = scmp.lt.s32.totalorder %s294_s12, 3 }
   0x4   : > { %p138_p2 = pnand %p269_p0, %p137_p1 }
   0x5   : > { %p161_p3 = scmp.lt.s32.totalorder (!%p138_p2), %s265_s13, 1  ;;  %s296_s18 = smov (!%p138_p2), 1   ;;  %v177_v2 = vlaneseq (!%p138_p2)  ;;  %v173_v5 = vld [vmem:[%s356_s1] sm:$0xff] (!%p138_p2)  ;;  %v174_v11 = vld [vmem:[%s356_s1 + $0x8] sm:$0xff] (!%p138_p2) }
   0x6   : > { %141 = sbr.rel (%p138_p2) target bundleno = 142 (0x8e), region = 32  ;;  %s297_s19 = smov (!%p138_p2), 127   ;;  %v175_v7 = vld [vmem:[%s357_s2] sm:$0xff] (!%p138_p2)  ;;  %v176_v14 = vld [vmem:[%s357_s2 + $0x8] sm:$0xff] (!%p138_p2) }
   0x7   : > { %v178_v3 = vand.u32 (!%p138_p2), 127, %v177_v2 }
   0x9   : > { %v183_v4 = vand.u32 (!%p138_p2), 1, %v178_v3 }
   0xb   : > { %vm332_vm0 = vcmp.eq.s32.totalorder (!%p138_p2), %v183_v4, 0 }
   0xd   : > { %s362_s13 = smov (!%p161_p3, %s265_s13), 1 }
   0xe   : > { %s276_s14 = sshll.u32 %s362_s13, 4 }
   0xf   : > { %s165_s17 = scalar_lea.vmem %s355_s0, %s276_s14  ;;  %s170_s28 = scalar_lea.vmem %s358_s3, %s276_s14 }
  0x10   : > { %v171_v0 = vld [vmem:[%s165_s17] sm:$0xff]  ;;  %v172_v1 = vld [vmem:[%s165_s17 + $0x8] sm:$0xff] }
  0x11   : > { %196 = vrot.lane.b32.xlu1 %v171_v0, %s296_s18  ;;  %192 = vrot.lane.b32.xlu0 %v171_v0, %s297_s19  ;;  %v202_v8 = vmul.f32 %v173_v5, %v171_v0  ;;  %v203_v15 = vmul.f32 %v174_v11, %v172_v1 }
  0x15   : > { %198 = vrot.lane.b32.xlu1 %v172_v1, %s296_s18  ;;  %194 = vrot.lane.b32.xlu0 %v172_v1, %s297_s19 }
  0x83   : > { %v197_v9 = vpop.permute.xlu1 %196  ;;  %v193_v10 = vpop.permute.xlu0 %192 }
  0x84   : > { %v200_v12 = vsel %vm332_vm0, %v193_v10, %v197_v9 }
  0x85   : > { %v204_v13 = vmul.f32 %v200_v12, %v175_v7 }
  0x87   : > { %v206_v16 = vadd.f32 %v204_v13, %v202_v8  ;;  %v199_v17 = vpop.permute.xlu1 %198  ;;  %v195_v18 = vpop.permute.xlu0 %194 }
  0x88   : > { %v201_v19 = vsel %vm332_vm0, %v195_v18, %v199_v17 }
  0x89   : > { %208 = vst [vmem:[%s170_s28] sm:$0xff] %v206_v16  ;;  %v205_v20 = vmul.f32 %v201_v19, %v176_v14 }
  0x8b   : > { %v207_v21 = vadd.f32 %v205_v20, %v203_v15 }
  0x8d   : > { %209 = vst [vmem:[%s170_s28 + $0x8] sm:$0xff] %v207_v21 }
  0x8e PF: > { %s13_s12 = sadd.s32 1, %s294_s12  }
  0x8f   : > { %p10_p4 = scmp.ge.s32.totalorder %s13_s12, 4  }
  0x91   :  { %12 = sbr.rel (!%p10_p4) target bundleno = 1 (0x1), region = 62 }

// kernel: transformer_lm_forward.23
= control target key start
LH: loop header
LB: loop body
LE: loop exit
PB: predicated region body
PF: predicated region fallthrough
CT: control target
= control target key end

     0   :  { %s344_s1 = inlined_call_operand.vmem [shape: f32[128,128], index: 1, kind: input, shape index: {}]   ;;  %s345_s0 = inlined_call_operand.vmem [shape: f32[32,128], index: 0, kind: input, shape index: {}]   ;;  %s346_s2 = inlined_call_operand.vmem [shape: f32[32,128], index: 2, kind: output, shape index: {}]  }
   0x1   :  { %v27_v0 = vld [vmem:[%s344_s1] sm:$0xff]  ;;  %v28_v1 = vld [vmem:[%s344_s1 + $0x8] sm:$0xff]  ;;  %v29_v2 = vld [vmem:[%s344_s1 + $0x10] sm:$0xff] }
   0x2   :  { %v209_v3 = vpack.c.bf16 %v28_v1, %v27_v0  ;;  %v30_v4 = vld [vmem:[%s344_s1 + $0x18] sm:$0xff]  ;;  %v31_v6 = vld [vmem:[%s344_s1 + $0x20] sm:$0xff]  ;;  %v32_v7 = vld [vmem:[%s344_s1 + $0x28] sm:$0xff] }
   0x3   :  { %v213_v5 = vpack.c.bf16 %v30_v4, %v29_v2  ;;  %v217_v8 = vpack.c.bf16 %v32_v7, %v31_v6  ;;  %v23_v9 = vld [vmem:[%s345_s0] sm:$0xff]  ;;  %v25_v10 = vld [vmem:[%s345_s0 + $0x10] sm:$0xff]  ;;  %v34_v12 = vld [vmem:[%s344_s1 + $0x38] sm:$0xff] }
   0x4   :  { %210 = vmatprep.subr.bf16.mxu0 %v209_v3  ;;  %241 = vmatprep.subr.bf16.mxu1 %v209_v3  ;;  %v33_v11 = vld [vmem:[%s344_s1 + $0x30] sm:$0xff]  ;;  %v35_v14 = vld [vmem:[%s344_s1 + $0x40] sm:$0xff]  ;;  %v36_v15 = vld [vmem:[%s344_s1 + $0x48] sm:$0xff] }
   0x5   :  { %212 = vmatpush3.bf16.msra.mxu0 %v209_v3  ;;  %249 = vmatpush3.bf16.msra.mxu1 %v209_v3  ;;  %v221_v13 = vpack.c.bf16 %v34_v12, %v33_v11  ;;  %v225_v16 = vpack.c.bf16 %v36_v15, %v35_v14  ;;  %v37_v17 = vld [vmem:[%s344_s1 + $0x50] sm:$0xff]  ;;  %v38_v18 = vld [vmem:[%s344_s1 + $0x58] sm:$0xff]  ;;  %v39_v20 = vld [vmem:[%s344_s1 + $0x60] sm:$0xff] }
   0x6   :  { %214 = vmatprep.subr.bf16.mxu0 %v213_v5  ;;  %242 = vmatprep.subr.bf16.mxu1 %v213_v5  ;;  %v229_v19 = vpack.c.bf16 %v38_v18, %v37_v17  ;;  %v40_v21 = vld [vmem:[%s344_s1 + $0x68] sm:$0xff]  ;;  %v41_v23 = vld [vmem:[%s344_s1 + $0x70] sm:$0xff]  ;;  %v42_v24 = vld [vmem:[%s344_s1 + $0x78] sm:$0xff] }
   0x7   :  { %203 = vmatprep.mubr.f32.mxu0 %v23_v9  ;;  %206 = vmatprep.mubr.f32.mxu1 %v25_v10  ;;  %v233_v22 = vpack.c.bf16 %v40_v21, %v39_v20  ;;  %v237_v25 = vpack.c.bf16 %v42_v24, %v41_v23  ;;  %v24_v26 = vld [vmem:[%s345_s0 + $0x8] sm:$0xff]  ;;  %v26_v27 = vld [vmem:[%s345_s0 + $0x18] sm:$0xff] }
   0x9   :  { %216 = vmatpush3.bf16.msra.mxu0 %v213_v5  ;;  %250 = vmatpush3.bf16.msra.mxu1 %v213_v5 }
   0xa   :  { %218 = vmatprep.subr.bf16.mxu0 %v217_v8  ;;  %243 = vmatprep.subr.bf16.mxu1 %v217_v8 }
   0xd   :  { %220 = vmatpush3.bf16.msra.mxu0 %v217_v8  ;;  %251 = vmatpush3.bf16.msra.mxu1 %v217_v8 }
   0xe   :  { %222 = vmatprep.subr.bf16.mxu0 %v221_v13  ;;  %244 = vmatprep.subr.bf16.mxu1 %v221_v13 }
  0x11   :  { %224 = vmatpush3.bf16.msra.mxu0 %v221_v13  ;;  %252 = vmatpush3.bf16.msra.mxu1 %v221_v13 }
  0x12   :  { %226 = vmatprep.subr.bf16.mxu0 %v225_v16  ;;  %245 = vmatprep.subr.bf16.mxu1 %v225_v16 }
  0x15   :  { %228 = vmatpush3.bf16.msra.mxu0 %v225_v16  ;;  %253 = vmatpush3.bf16.msra.mxu1 %v225_v16 }
  0x16   :  { %230 = vmatprep.subr.bf16.mxu0 %v229_v19  ;;  %246 = vmatprep.subr.bf16.mxu1 %v229_v19 }
  0x19   :  { %232 = vmatpush3.bf16.msra.mxu0 %v229_v19  ;;  %254 = vmatpush3.bf16.msra.mxu1 %v229_v19 }
  0x1a   :  { %234 = vmatprep.subr.bf16.mxu0 %v233_v22  ;;  %247 = vmatprep.subr.bf16.mxu1 %v233_v22 }
  0x1d   :  { %236 = vmatpush3.bf16.msra.mxu0 %v233_v22  ;;  %255 = vmatpush3.bf16.msra.mxu1 %v233_v22 }
  0x1e   :  { %238 = vmatprep.subr.bf16.mxu0 %v237_v25  ;;  %248 = vmatprep.subr.bf16.mxu1 %v237_v25 }
  0x21   :  { %240 = vmatpush3.bf16.msra.mxu0 %v237_v25  ;;  %256 = vmatpush3.bf16.msra.mxu1 %v237_v25 }
  0x24   :  { %204 = vmatmul.mubr.f32.vlgmr.msra.gmra.mrb[0].mxu0 %v24_v26  ;;  %207 = vmatmul.mubr.f32.vlgmr.msra.gmra.mrb[0].mxu1 %v26_v27 }
  0xf7   :  { %v205_v28 = vpop.f32.mrb[0].mxu0  ;;  %v208_v29 = vpop.f32.mrb[0].mxu1 }
  0xf8   :  { %144 = vst [vmem:[%s346_s2 + $0x8] sm:$0xff] %v205_v28  ;;  %146 = vst [vmem:[%s346_s2 + $0x18] sm:$0xff] %v208_v29  ;;  %v109_v30 = vpop.f32.mrb[1].mxu0  ;;  %v119_v31 = vpop.f32.mrb[1].mxu1 }
  0xf9   :  { %143 = vst [vmem:[%s346_s2] sm:$0xff] %v109_v30  ;;  %145 = vst [vmem:[%s346_s2 + $0x10] sm:$0xff] %v119_v31 }

// kernel: transformer_lm_forward.22
= control target key start
LH: loop header
LB: loop body
LE: loop exit
PB: predicated region body
PF: predicated region fallthrough
CT: control target
= control target key end

     0   :  { %s788_s12 = smov 0   ;;  %s790_s13 = smov 0   ;;  %s863_s0 = inlined_call_operand.vmem [shape: f32[2,4,16,32], index: 0, kind: input, shape index: {}]   ;;  %s864_s1 = inlined_call_operand.vmem [shape: f32[2,4,16,32], index: 1, kind: input, shape index: {}]   ;;  %s865_s2 = inlined_call_operand.vmem [shape: f32[2,4,16,32], index: 2, kind: input, shape index: {}]   ;;  %s866_s3 = inlined_call_operand.vmem [shape: f32[2,4,16,32], index: 3, kind: output, shape index: {}]  }
   0x1   :  { %s792_s14 = smov 0   ;;  %s794_s15 = smov 0  }
   0x2   :  { %s796_s16 = smov 0  }
   0x3 LB: > { %s22_s17 = sadd.s32 1, %s758_s14  ;;  %s25_s18 = sadd.s32 1, %s762_s15  ;;  %s766_s16 = sphi %s796_s16, %s13_s16   ;;  %s762_s15 = sphi %s794_s15, %s870_s15   ;;  %s758_s14 = sphi %s792_s14, %s869_s14   ;;  %s754_s13 = sphi %s790_s13, %s868_s13   ;;  %s750_s12 = sphi %s788_s12, %s867_s12  }
   0x4   : > { %p23_p0 = scmp.ge.s32.totalorder %s22_s17, 4  ;;  %p627_p1 = scmp.ge.s32.totalorder %s766_s16, 1 }
   0x5   : > { %p189_p2 = scmp.lt.s32.totalorder %s766_s16, 9 }
   0x6   : > { %s872_s17 = smov (%p23_p0, %s22_s17), 0  ;;  %s874_s18 = smov (!%p23_p0, %s25_s18), %s762_s15 }
   0x7   : > { %p190_p3 = pnand %p627_p1, %p189_p2  ;;  %p27_p4 = scmp.ge.s32.totalorder %s874_s18, 2 }
   0x8   : > { %p239_p5 = scmp.lt.s32.totalorder (!%p190_p3), %s754_s13, 1  ;;  %p241_p6 = scmp.lt.s32.totalorder (!%p190_p3), %s750_s12, 3  ;;  %vm281_vm0 = vcmask (!%p190_p3), 261120   ;;  %v371_v5 = vlaneseq (!%p190_p3)  ;;  %vm380_vm3 = vcmask (!%p190_p3), 130048  }
   0x9   : > { %s876_s18 = smov (%p27_p4, %s874_s18), 0  ;;  %193 = sbr.rel (%p190_p3) target bundleno = 626 (0x272), region = 32 }
   0xa   : > { %vm671_vm1 = vmpackc.low (!%p190_p3), %vm281_vm0, %vm281_vm0  ;;  %v372_v6 = vshrl.u32 (!%p190_p3), %v371_v5, 7  ;;  %v375_v7 = vand.u32 (!%p190_p3), 127, %v371_v5 }
   0xc   : > { %v373_v8 = vadd.s32 (!%p190_p3), 8, %v372_v6  ;;  %vm376_vm2 = vcmp.le.s32.totalorder (!%p190_p3), %v375_v7, %v372_v6 }
   0xe   : > { %vm377_vm4 = vcmp.le.s32.totalorder (!%p190_p3), %v375_v7, %v373_v8 }
  0x10   : > { %s878_s13 = smov (!%p239_p5, %s754_s13), 1  ;;  %s880_s12 = smov (!%p241_p6, %s750_s12), 3 }
  0x11   : > { %s629_s19 = sshll.u32 %s878_s13, 3  ;;  %s628_s20 = sshll.u32 %s880_s12, 1 }
  0x12   : > { %s245_s21 = sadd.s32 %s629_s19, %s628_s20 }
  0x13   : > { %s818_s22 = sshll.u32 %s245_s21, 3 }
  0x14   : > { %s256_s25 = scalar_lea.vmem %s864_s1, %s818_s22  ;;  %s247_s28 = scalar_lea.vmem %s863_s0, %s818_s22 }
  0x15   : > { %v277_v0 = vld [vmem:[%s256_s25] sm:$0xff]  ;;  %v278_v1 = vld [vmem:[%s256_s25 + $0x8] sm:$0xff]  ;;  %s265_s4 = scalar_lea.vmem %s865_s2, %s818_s22  ;;  %s274_s7 = scalar_lea.vmem %s866_s3, %s818_s22 }
  0x16   : > { %v275_v2 = vld [vmem:[%s247_s28] sm:$0xff]  ;;  %v670_v3 = vpack.c.bf16 %v278_v1, %v277_v0  ;;  %v276_v4 = vld [vmem:[%s247_s28 + $0x8] sm:$0xff] }
  0x17   : > { %660 = vmatprep.mubr.msk.f32.mxu0 %vm281_vm0, %v275_v2  ;;  %v279_v17 = vld [vmem:[%s265_s4] sm:$0xff]  ;;  %v280_v18 = vld [vmem:[%s265_s4 + $0x8] sm:$0xff] }
  0x18   : > { %672 = vmatprep.subr.msk.bf16.mxu0 %vm671_vm1, %v670_v3  ;;  %v676_v19 = vpack.c.bf16 %v280_v18, %v279_v17 }
  0x19   : > { %675 = vmatpush3.bf16.xpose.msk.msra.mxu0 %vm671_vm1, %v670_v3 }
  0x1a   : > { %677 = vmatprep.subr.bf16.mxu1 %v676_v19 }
  0x1b   : > { %679 = vmatpush3.bf16.msra.mxu1 %v676_v19 }
  0x20   : > { %661 = vmatmul.mubr.msk.f32.vlgmr.msra.gmra.mrb[0].mxu0 %vm281_vm0, %v276_v4 }
  0xf3   : > { %v662_v9 = vpop.f32.mrb[0].mxu0 }
  0xf4   : > { %v360_v10 = vpop.f32.mrb[1].mxu0  ;;  %v370_v11 = vmul.f32 0.17677669, %v662_v9 }
  0xf5   : > { %v369_v12 = vmul.f32 0.17677669, %v360_v10 }
  0xf6   : > { %v379_v15 = vsel %vm377_vm4, %v370_v11, -1e+30 }
  0xf7   : > { %v378_v13 = vsel %vm376_vm2, %v369_v12, -1e+30  ;;  %v384_v16 = vsel %vm380_vm3, %v379_v15, -inf }
  0xf8   : > { %v381_v14 = vsel %vm380_vm3, %v378_v13, -inf }
  0xf9   : > { %382 = vmax.xlane.f32.xlu0 %v381_v14 }
  0xfd   : > { %385 = vmax.xlane.f32.xlu0 %v384_v16 }
 0x186   : > { %v383_v20 = vpop.xlane.xlu0 %382 }
 0x187   : > { %v387_v21 = vsub.f32 %v378_v13, %v383_v20 }
 0x189   : > { %v389_v22 = vmul.f32 1.442695, %v387_v21 }
 0x18a   : > { %v386_v23 = vpop.xlane.xlu0 %385 }
 0x18b   : > { %720 = vpow2.f32 %v389_v22  ;;  %v388_v24 = vsub.f32 %v379_v15, %v386_v23 }
 0x18d   : > { %v391_v25 = vmul.f32 1.442695, %v388_v24 }
 0x18f   : > { %722 = vpow2.f32 %v391_v25 }
 0x195   : > { %v721_v26 = vpop.eup %720 }
 0x196   : > { %667 = vmatprep.mubr.msk.f32.mxu1 %vm380_vm3, %v721_v26  ;;  %v393_v27 = vsel %vm380_vm3, %v721_v26, 0.0 }
 0x197   : > { %394 = vadd.xlane.f32.xlu1 %v393_v27 }
 0x199   : > { %v723_v28 = vpop.eup %722 }
 0x19a   : > { %668 = vmatmul.mubr.msk.f32.vlgmr.msra.gmra.mrb[0].mxu1 %vm380_vm3, %v723_v28  ;;  %v396_v29 = vsel %vm380_vm3, %v723_v28, 0.0 }
 0x19b   : > { %397 = vadd.xlane.f32.xlu1 %v396_v29 }
 0x224   : > { %v395_v30 = vpop.xlane.xlu1 %394 }
 0x228   : > { %v398_v31 = vpop.xlane.xlu1 %397 }
 0x229   : > { %724 = vrcp.f32 %v398_v31 }
 0x22a   : > { %726 = vrcp.f32 %v395_v30 }
 0x233   : > { %v725_v32 = vpop.eup %724 }
 0x234   : > { %v727_v34 = vpop.eup %726 }
 0x26d   : > { %v669_v33 = vpop.f32.mrb[0].mxu1 }
 0x26e   : > { %v483_v35 = vmul.f32 %v725_v32, %v669_v33  ;;  %v471_v36 = vpop.f32.mrb[1].mxu1 }
 0x26f   : > { %v481_v37 = vmul.f32 %v727_v34, %v471_v36 }
 0x270   : > { %485 = vst.msk [vmem:[%s274_s7 + $0x8] sm:$0xff] %vm281_vm0, %v483_v35 }
 0x271   : > { %484 = vst.msk [vmem:[%s274_s7] sm:$0xff] %vm281_vm0, %v481_v37 }
 0x272 PF: > { %s13_s16 = sadd.s32 1, %s766_s16   ;;  %s867_s12 = smov %s758_s14 }
 0x273   : > { %p10_p7 = scmp.ge.s32.totalorder %s13_s16, 10   ;;  %s868_s13 = smov %s762_s15 }
 0x274   : > { %s869_s14 = smov %s872_s17  ;;  %s870_s15 = smov %s876_s18 }
 0x275   :  { %12 = sbr.rel (!%p10_p7) target bundleno = 3 (0x3), region = 68 }

// kernel: transformer_lm_forward.35
= control target key start
LH: loop header
LB: loop body
LE: loop exit
PB: predicated region body
PF: predicated region fallthrough
CT: control target
= control target key end

     0   :  { %v284_v7 = vmov 0.0   ;;  %s427_s0 = inlined_call_operand.vmem [shape: f32[32,128], index: 0, kind: input, shape index: {}]   ;;  %s428_s1 = inlined_call_operand.vmem [shape: f32[128,256], index: 1, kind: input, shape index: {}]   ;;  %s429_s2 = inlined_call_operand.hbm [shape: f32[32,256], index: 2, kind: output, shape index: {}]  }
   0x1   :  { %v37_v0 = vld [vmem:[%s428_s1 + $0x8] sm:$0xff]  ;;  %v39_v1 = vld [vmem:[%s428_s1 + $0x18] sm:$0xff]  ;;  %v36_v2 = vld [vmem:[%s428_s1] sm:$0xff]  ;;  %132 = vmatprep.mubr.f32.mxu0 %v284_v7  ;;  %144 = vmatprep.mubr.f32.mxu1 %v284_v7 }
   0x2   :  { %v208_v3 = vpack.c.bf16 %v39_v1, %v37_v0  ;;  %v38_v4 = vld [vmem:[%s428_s1 + $0x10] sm:$0xff]  ;;  %v41_v5 = vld [vmem:[%s428_s1 + $0x28] sm:$0xff]  ;;  %v43_v6 = vld [vmem:[%s428_s1 + $0x38] sm:$0xff] }
   0x3   :  { %v210_v8 = vpack.c.bf16 %v38_v4, %v36_v2  ;;  %v212_v9 = vpack.c.bf16 %v43_v6, %v41_v5  ;;  %v40_v10 = vld [vmem:[%s428_s1 + $0x20] sm:$0xff]  ;;  %v42_v11 = vld [vmem:[%s428_s1 + $0x30] sm:$0xff]  ;;  %v45_v12 = vld [vmem:[%s428_s1 + $0x48] sm:$0xff] }
   0x4   :  { %209 = vmatprep.subr.bf16.mxu0 %v208_v3  ;;  %240 = vmatprep.subr.bf16.mxu1 %v208_v3  ;;  %v47_v13 = vld [vmem:[%s428_s1 + $0x58] sm:$0xff]  ;;  %v214_v14 = vpack.c.bf16 %v42_v11, %v40_v10  ;;  %v44_v16 = vld [vmem:[%s428_s1 + $0x40] sm:$0xff]  ;;  %v46_v17 = vld [vmem:[%s428_s1 + $0x50] sm:$0xff] }
   0x5   :  { %211 = vmatpush1.bf16.msra.mxu0 %v210_v8  ;;  %248 = vmatpush1.bf16.msra.mxu1 %v210_v8  ;;  %v216_v15 = vpack.c.bf16 %v47_v13, %v45_v12  ;;  %v49_v18 = vld [vmem:[%s428_s1 + $0x68] sm:$0xff]  ;;  %v51_v19 = vld [vmem:[%s428_s1 + $0x78] sm:$0xff]  ;;  %v218_v20 = vpack.c.bf16 %v46_v17, %v44_v16  ;;  %v48_v22 = vld [vmem:[%s428_s1 + $0x60] sm:$0xff] }
   0x6   :  { %213 = vmatprep.subr.bf16.mxu0 %v212_v9  ;;  %241 = vmatprep.subr.bf16.mxu1 %v212_v9  ;;  %v220_v21 = vpack.c.bf16 %v51_v19, %v49_v18  ;;  %v50_v23 = vld [vmem:[%s428_s1 + $0x70] sm:$0xff]  ;;  %v53_v24 = vld [vmem:[%s428_s1 + $0x88] sm:$0xff]  ;;  %v55_v25 = vld [vmem:[%s428_s1 + $0x98] sm:$0xff] }
   0x7   :  { %v222_v26 = vpack.c.bf16 %v50_v23, %v48_v22 }
   0x9   :  { %215 = vmatpush1.bf16.msra.mxu0 %v214_v14  ;;  %249 = vmatpush1.bf16.msra.mxu1 %v214_v14 }
   0xa   :  { %217 = vmatprep.subr.bf16.mxu0 %v216_v15  ;;  %242 = vmatprep.subr.bf16.mxu1 %v216_v15 }
   0xd   :  { %219 = vmatpush1.bf16.msra.mxu0 %v218_v20  ;;  %250 = vmatpush1.bf16.msra.mxu1 %v218_v20 }
   0xe   :  { %7 = vsyncpa [#allocation4], 0  ;;  %221 = vmatprep.subr.bf16.mxu0 %v220_v21  ;;  %243 = vmatprep.subr.bf16.mxu1 %v220_v21  ;;  %v224_v27 = vpack.c.bf16 %v55_v25, %v53_v24  ;;  %v52_v28 = vld [vmem:[%s428_s1 + $0x80] sm:$0xff]  ;;  %v54_v29 = vld [vmem:[%s428_s1 + $0x90] sm:$0xff]  ;;  %s285_s24 = smov [#allocation3]  }
   0xf   :  { %v57_v30 = vld [vmem:[%s428_s1 + $0xa8] sm:$0xff]  ;;  %v59_v31 = vld [vmem:[%s428_s1 + $0xb8] sm:$0xff]  ;;  %v226_v32 = vpack.c.bf16 %v54_v29, %v52_v28  ;;  %v56_v34 = vld [vmem:[%s428_s1 + $0xa0] sm:$0xff]  ;;  %s197_s25 = sshll.u32 %s285_s24, 4  ;;  %s198_s25 = int_to_ptr.vmem [resolvable:$true] %s197_s25 }
  0x10   :  { %v228_v33 = vpack.c.bf16 %v59_v31, %v57_v30  ;;  %v58_v35 = vld [vmem:[%s428_s1 + $0xb0] sm:$0xff]  ;;  %v61_v36 = vld [vmem:[%s428_s1 + $0xc8] sm:$0xff]  ;;  %v63_v37 = vld [vmem:[%s428_s1 + $0xd8] sm:$0xff]  ;;  %p265_p1 = scmp.lt.s32.totalorder %s198_s25, %s198_s25 }
  0x11   :  { %223 = vmatpush1.bf16.msra.mxu0 %v222_v26  ;;  %251 = vmatpush1.bf16.msra.mxu1 %v222_v26  ;;  %v230_v38 = vpack.c.bf16 %v58_v35, %v56_v34  ;;  %v232_v39 = vpack.c.bf16 %v63_v37, %v61_v36  ;;  %v60_v40 = vld [vmem:[%s428_s1 + $0xc0] sm:$0xff]  ;;  %v62_v41 = vld [vmem:[%s428_s1 + $0xd0] sm:$0xff]  ;;  %v65_v42 = vld [vmem:[%s428_s1 + $0xe8] sm:$0xff] }
  0x12   :  { %225 = vmatprep.subr.bf16.mxu0 %v224_v27  ;;  %244 = vmatprep.subr.bf16.mxu1 %v224_v27  ;;  %v67_v43 = vld [vmem:[%s428_s1 + $0xf8] sm:$0xff]  ;;  %v234_v44 = vpack.c.bf16 %v62_v41, %v60_v40  ;;  %v64_v46 = vld [vmem:[%s428_s1 + $0xe0] sm:$0xff]  ;;  %v66_v47 = vld [vmem:[%s428_s1 + $0xf0] sm:$0xff] }
  0x13   :  { %v236_v45 = vpack.c.bf16 %v67_v43, %v65_v42  ;;  %v238_v48 = vpack.c.bf16 %v66_v47, %v64_v46  ;;  %v32_v49 = vld [vmem:[%s427_s0] sm:$0xff]  ;;  %v34_v50 = vld [vmem:[%s427_s0 + $0x10] sm:$0xff]  ;;  %v33_v51 = vld [vmem:[%s427_s0 + $0x8] sm:$0xff] }
  0x14   :  { %v35_v52 = vld [vmem:[%s427_s0 + $0x18] sm:$0xff]  ;;  %s260_s0 = scalar_lea.vmem %s198_s25, 1024 }
  0x15   :  { %227 = vmatpush1.bf16.msra.mxu0 %v226_v32  ;;  %252 = vmatpush1.bf16.msra.mxu1 %v226_v32  ;;  %p261_p0 = scmp.ne.s32.totalorder %s198_s25, %s260_s0  ;;  %p266_p2 = scmp.lt.s32.totalorder %s260_s0, %s260_s0 }
  0x16   :  { %229 = vmatprep.subr.bf16.mxu0 %v228_v33  ;;  %245 = vmatprep.subr.bf16.mxu1 %v228_v33 }
  0x17   :  { %p267_p3 = por %p266_p2, %p265_p1 }
  0x19   :  { %231 = vmatpush1.bf16.msra.mxu0 %v230_v38  ;;  %253 = vmatpush1.bf16.msra.mxu1 %v230_v38  ;;  %p268_p4 = pnand %p267_p3, %p261_p0 }
  0x1a   :  { %233 = vmatprep.subr.bf16.mxu0 %v232_v39  ;;  %246 = vmatprep.subr.bf16.mxu1 %v232_v39 }
  0x1d   :  { %235 = vmatpush1.bf16.msra.mxu0 %v234_v44  ;;  %254 = vmatpush1.bf16.msra.mxu1 %v234_v44 }
  0x1e   :  { %237 = vmatprep.subr.bf16.mxu0 %v236_v45  ;;  %247 = vmatprep.subr.bf16.mxu1 %v236_v45 }
  0x21   :  { %239 = vmatpush1.bf16.msra.mxu0 %v238_v48  ;;  %255 = vmatpush1.bf16.msra.mxu1 %v238_v48 }
  0x24   :  { %133 = vmatmul.mubr.f32.vlgmr.msra.gmra.mrb[0].mxu0 %v32_v49  ;;  %145 = vmatmul.mubr.f32.vlgmr.msra.gmra.mrb[0].mxu1 %v34_v50 }
  0x25   :  { %138 = vmatprep.mubr.f32.mxu0 %v284_v7  ;;  %150 = vmatprep.mubr.f32.mxu1 %v284_v7 }
  0x28   :  { %139 = vmatmul.mubr.f32.gmra.mrb[2].mxu0 %v33_v51  ;;  %151 = vmatmul.mubr.f32.gmra.mrb[2].mxu1 %v35_v52 }
  0xf7   :  { %v134_v53 = vpop.f32.mrb[0].mxu0  ;;  %v146_v54 = vpop.f32.mrb[0].mxu1 }
  0xf8   :  { %184 = vst [vmem:[#allocation3] sm:$0xff] %v134_v53  ;;  %188 = vst [vmem:[#allocation3 + $0x20] sm:$0xff] %v146_v54  ;;  %v136_v55 = vpop.f32.mrb[1].mxu0  ;;  %v148_v56 = vpop.f32.mrb[1].mxu1 }
  0xf9   :  { %185 = vst [vmem:[#allocation3 + $0x8] sm:$0xff] %v136_v55  ;;  %189 = vst [vmem:[#allocation3 + $0x28] sm:$0xff] %v148_v56 }
  0xfb   :  { %v140_v57 = vpop.f32.mrb[2].mxu0  ;;  %v152_v58 = vpop.f32.mrb[2].mxu1 }
  0xfc   :  { %186 = vst [vmem:[#allocation3 + $0x10] sm:$0xff] %v140_v57  ;;  %190 = vst [vmem:[#allocation3 + $0x30] sm:$0xff] %v152_v58  ;;  %v142_v59 = vpop.f32.mrb[3].mxu0  ;;  %v154_v60 = vpop.f32.mrb[3].mxu1 }
  0xfd   :  { %187 = vst [vmem:[#allocation3 + $0x18] sm:$0xff] %v142_v59  ;;  %191 = vst [vmem:[#allocation3 + $0x38] sm:$0xff] %v154_v60 }
  0xfe   :  { %271 = shalt.err (!%p268_p4)
}
  0xff   :  { %s272_s28 = scalar_lea.hbm %s429_s2, 1024 }
 0x100   :  { %p273_p5 = scmp.ne.s32.totalorder %s429_s2, %s272_s28  ;;  %p276_p6 = scmp.lt.u32.totalorder %s272_s28, %s429_s2 }
 0x102   :  { %p278_p7 = pnand %p276_p6, %p273_p5 }
 0x104   :  { %281 = shalt.err (!%p278_p7)
}
 0x105   :  { %s286_s5 = smov 256   ;;  %s287_s6 = smov 16  }
 0x106   :  { %203 = dma.vmem_to_hbm [thread:$0]  %s198_s25, 1024, %s429_s2, [#allocation4], %s286_s5, %s286_s5, %s287_s6  }
 0x107   :  { %282 = dma.done.wait [#allocation4], 1024  }
 0x108   :  { %283 = vsyncadd [#allocation4], 4294966272 }
 0x109   :  { %207 = vsyncpa [#allocation4], 1 }

// kernel: transformer_lm_forward.25
= control target key start
LH: loop header
LB: loop body
LE: loop exit
PB: predicated region body
PF: predicated region fallthrough
CT: control target
= control target key end

     0   :  { %v641_v3 = vmov 0.0   ;;  %s1011_s1 = inlined_call_operand.vmem [shape: f32[128,256], index: 1, kind: input, shape index: {}]   ;;  %s1012_s2 = inlined_call_operand.vmem [shape: f32[128,256], index: 2, kind: input, shape index: {}]   ;;  %s1013_s0 = inlined_call_operand.vmem [shape: f32[32,128], index: 0, kind: input, shape index: {}]   ;;  %s1014_s3 = inlined_call_operand.vmem [shape: f32[256,128], index: 3, kind: input, shape index: {}]   ;;  %s1015_s4 = inlined_call_operand.vmem [shape: f32[32,128], index: 4, kind: output, shape index: {}]  }
   0x1   :  { %v22_v0 = vld [vmem:[%s1011_s1 + $0x8] sm:$0xff]  ;;  %v24_v1 = vld [vmem:[%s1011_s1 + $0x18] sm:$0xff]  ;;  %v21_v2 = vld [vmem:[%s1011_s1] sm:$0xff]  ;;  %117 = vmatprep.mubr.f32.mxu0 %v641_v3  ;;  %238 = vmatprep.mubr.f32.mxu1 %v641_v3 }
   0x2   :  { %v496_v4 = vpack.c.bf16 %v24_v1, %v22_v0  ;;  %v23_v5 = vld [vmem:[%s1011_s1 + $0x10] sm:$0xff]  ;;  %v26_v6 = vld [vmem:[%s1011_s1 + $0x28] sm:$0xff]  ;;  %v28_v7 = vld [vmem:[%s1011_s1 + $0x38] sm:$0xff] }
   0x3   :  { %v498_v8 = vpack.c.bf16 %v23_v5, %v21_v2  ;;  %v500_v9 = vpack.c.bf16 %v28_v7, %v26_v6  ;;  %v25_v10 = vld [vmem:[%s1011_s1 + $0x20] sm:$0xff]  ;;  %v27_v11 = vld [vmem:[%s1011_s1 + $0x30] sm:$0xff]  ;;  %v30_v12 = vld [vmem:[%s1011_s1 + $0x48] sm:$0xff] }
   0x4   :  { %497 = vmatprep.subr.bf16.mxu0 %v496_v4  ;;  %v32_v13 = vld [vmem:[%s1011_s1 + $0x58] sm:$0xff]  ;;  %v502_v14 = vpack.c.bf16 %v27_v11, %v25_v10  ;;  %v29_v16 = vld [vmem:[%s1011_s1 + $0x40] sm:$0xff]  ;;  %v31_v17 = vld [vmem:[%s1011_s1 + $0x50] sm:$0xff] }
   0x5   :  { %499 = vmatpush1.bf16.msra.mxu0 %v498_v8  ;;  %v504_v15 = vpack.c.bf16 %v32_v13, %v30_v12  ;;  %v34_v18 = vld [vmem:[%s1011_s1 + $0x68] sm:$0xff]  ;;  %v36_v19 = vld [vmem:[%s1011_s1 + $0x78] sm:$0xff]  ;;  %v506_v20 = vpack.c.bf16 %v31_v17, %v29_v16  ;;  %v33_v22 = vld [vmem:[%s1011_s1 + $0x60] sm:$0xff] }
   0x6   :  { %501 = vmatprep.subr.bf16.mxu0 %v500_v9  ;;  %v508_v21 = vpack.c.bf16 %v36_v19, %v34_v18  ;;  %v35_v23 = vld [vmem:[%s1011_s1 + $0x70] sm:$0xff]  ;;  %v38_v24 = vld [vmem:[%s1011_s1 + $0x88] sm:$0xff]  ;;  %v40_v25 = vld [vmem:[%s1011_s1 + $0x98] sm:$0xff] }
   0x7   :  { %v143_v26 = vld [vmem:[%s1012_s2 + $0x8] sm:$0xff]  ;;  %v37_v27 = vld [vmem:[%s1011_s1 + $0x80] sm:$0xff]  ;;  %v145_v28 = vld [vmem:[%s1012_s2 + $0x18] sm:$0xff]  ;;  %v510_v31 = vpack.c.bf16 %v35_v23, %v33_v22  ;;  %v512_v37 = vpack.c.bf16 %v40_v25, %v38_v24 }
   0x8   :  { %v142_v29 = vld [vmem:[%s1012_s2] sm:$0xff]  ;;  %v144_v30 = vld [vmem:[%s1012_s2 + $0x10] sm:$0xff]  ;;  %v528_v33 = vpack.c.bf16 %v145_v28, %v143_v26  ;;  %v147_v35 = vld [vmem:[%s1012_s2 + $0x28] sm:$0xff] }
   0x9   :  { %503 = vmatpush1.bf16.msra.mxu0 %v502_v14  ;;  %v39_v32 = vld [vmem:[%s1011_s1 + $0x90] sm:$0xff]  ;;  %v530_v34 = vpack.c.bf16 %v144_v30, %v142_v29  ;;  %v149_v36 = vld [vmem:[%s1012_s2 + $0x38] sm:$0xff]  ;;  %v42_v38 = vld [vmem:[%s1011_s1 + $0xa8] sm:$0xff] }
   0xa   :  { %505 = vmatprep.subr.bf16.mxu0 %v504_v15  ;;  %v532_v39 = vpack.c.bf16 %v149_v36, %v147_v35  ;;  %v146_v40 = vld [vmem:[%s1012_s2 + $0x20] sm:$0xff]  ;;  %v148_v41 = vld [vmem:[%s1012_s2 + $0x30] sm:$0xff]  ;;  %v44_v42 = vld [vmem:[%s1011_s1 + $0xb8] sm:$0xff]  ;;  %529 = vmatprep.subr.bf16.mxu1 %v528_v33  ;;  %v514_v46 = vpack.c.bf16 %v39_v32, %v37_v27 }
   0xb   :  { %v151_v43 = vld [vmem:[%s1012_s2 + $0x48] sm:$0xff]  ;;  %v153_v44 = vld [vmem:[%s1012_s2 + $0x58] sm:$0xff]  ;;  %531 = vmatpush1.bf16.msra.mxu1 %v530_v34  ;;  %v534_v45 = vpack.c.bf16 %v148_v41, %v146_v40  ;;  %v41_v47 = vld [vmem:[%s1011_s1 + $0xa0] sm:$0xff]  ;;  %v516_v51 = vpack.c.bf16 %v44_v42, %v42_v38 }
   0xc   :  { %533 = vmatprep.subr.bf16.mxu1 %v532_v39  ;;  %v536_v48 = vpack.c.bf16 %v153_v44, %v151_v43  ;;  %v150_v49 = vld [vmem:[%s1012_s2 + $0x40] sm:$0xff]  ;;  %v152_v50 = vld [vmem:[%s1012_s2 + $0x50] sm:$0xff]  ;;  %v155_v53 = vld [vmem:[%s1012_s2 + $0x68] sm:$0xff] }
   0xd   :  { %507 = vmatpush1.bf16.msra.mxu0 %v506_v20  ;;  %v43_v52 = vld [vmem:[%s1011_s1 + $0xb0] sm:$0xff]  ;;  %v157_v54 = vld [vmem:[%s1012_s2 + $0x78] sm:$0xff]  ;;  %v46_v55 = vld [vmem:[%s1011_s1 + $0xc8] sm:$0xff]  ;;  %v538_v57 = vpack.c.bf16 %v152_v50, %v150_v49 }
   0xe   :  { %509 = vmatprep.subr.bf16.mxu0 %v508_v21  ;;  %v48_v56 = vld [vmem:[%s1011_s1 + $0xd8] sm:$0xff]  ;;  %v518_v58 = vpack.c.bf16 %v43_v52, %v41_v47  ;;  %v45_v59 = vld [vmem:[%s1011_s1 + $0xc0] sm:$0xff]  ;;  %v540_v60 = vpack.c.bf16 %v157_v54, %v155_v53  ;;  %v156_v62 = vld [vmem:[%s1012_s2 + $0x70] sm:$0xff] }
   0xf   :  { %535 = vmatpush1.bf16.msra.mxu1 %v534_v45  ;;  %v154_v61 = vld [vmem:[%s1012_s2 + $0x60] sm:$0xff]  ;;  %v520_v63 = vpack.c.bf16 %v48_v56, %v46_v55  ;;  %v47_v0 = vld [vmem:[%s1011_s1 + $0xd0] sm:$0xff]  ;;  %v159_v1 = vld [vmem:[%s1012_s2 + $0x88] sm:$0xff] }
  0x10   :  { %537 = vmatprep.subr.bf16.mxu1 %v536_v48  ;;  %v161_v2 = vld [vmem:[%s1012_s2 + $0x98] sm:$0xff]  ;;  %v50_v4 = vld [vmem:[%s1011_s1 + $0xe8] sm:$0xff]  ;;  %v542_v6 = vpack.c.bf16 %v156_v62, %v154_v61  ;;  %v522_v7 = vpack.c.bf16 %v47_v0, %v45_v59  ;;  %v49_v8 = vld [vmem:[%s1011_s1 + $0xe0] sm:$0xff] }
  0x11   :  { %511 = vmatpush1.bf16.msra.mxu0 %v510_v31  ;;  %v52_v5 = vld [vmem:[%s1011_s1 + $0xf8] sm:$0xff]  ;;  %v544_v9 = vpack.c.bf16 %v161_v2, %v159_v1  ;;  %v158_v10 = vld [vmem:[%s1012_s2 + $0x80] sm:$0xff]  ;;  %v160_v11 = vld [vmem:[%s1012_s2 + $0x90] sm:$0xff] }
  0x12   :  { %513 = vmatprep.subr.bf16.mxu0 %v512_v37  ;;  %v524_v12 = vpack.c.bf16 %v52_v5, %v50_v4  ;;  %v51_v13 = vld [vmem:[%s1011_s1 + $0xf0] sm:$0xff]  ;;  %v163_v14 = vld [vmem:[%s1012_s2 + $0xa8] sm:$0xff]  ;;  %v165_v15 = vld [vmem:[%s1012_s2 + $0xb8] sm:$0xff]  ;;  %v546_v16 = vpack.c.bf16 %v160_v11, %v158_v10 }
  0x13   :  { %539 = vmatpush1.bf16.msra.mxu1 %v538_v57  ;;  %v526_v17 = vpack.c.bf16 %v51_v13, %v49_v8  ;;  %v548_v18 = vpack.c.bf16 %v165_v15, %v163_v14  ;;  %v162_v19 = vld [vmem:[%s1012_s2 + $0xa0] sm:$0xff]  ;;  %v164_v20 = vld [vmem:[%s1012_s2 + $0xb0] sm:$0xff]  ;;  %v167_v21 = vld [vmem:[%s1012_s2 + $0xc8] sm:$0xff] }
  0x14   :  { %541 = vmatprep.subr.bf16.mxu1 %v540_v60  ;;  %v169_v22 = vld [vmem:[%s1012_s2 + $0xd8] sm:$0xff]  ;;  %v550_v23 = vpack.c.bf16 %v164_v20, %v162_v19  ;;  %v17_v24 = vld [vmem:[%s1013_s0] sm:$0xff]  ;;  %v168_v27 = vld [vmem:[%s1012_s2 + $0xd0] sm:$0xff] }
  0x15   :  { %515 = vmatpush1.bf16.msra.mxu0 %v514_v46  ;;  %v552_v25 = vpack.c.bf16 %v169_v22, %v167_v21  ;;  %v166_v26 = vld [vmem:[%s1012_s2 + $0xc0] sm:$0xff]  ;;  %v171_v28 = vld [vmem:[%s1012_s2 + $0xe8] sm:$0xff]  ;;  %v173_v29 = vld [vmem:[%s1012_s2 + $0xf8] sm:$0xff] }
  0x16   :  { %517 = vmatprep.subr.bf16.mxu0 %v516_v51  ;;  %v554_v30 = vpack.c.bf16 %v168_v27, %v166_v26  ;;  %v18_v31 = vld [vmem:[%s1013_s0 + $0x8] sm:$0xff]  ;;  %v556_v32 = vpack.c.bf16 %v173_v29, %v171_v28  ;;  %v170_v33 = vld [vmem:[%s1012_s2 + $0xe0] sm:$0xff]  ;;  %v172_v34 = vld [vmem:[%s1012_s2 + $0xf0] sm:$0xff] }
  0x17   :  { %543 = vmatpush1.bf16.msra.mxu1 %v542_v6  ;;  %v558_v35 = vpack.c.bf16 %v172_v34, %v170_v33  ;;  %v19_v36 = vld [vmem:[%s1013_s0 + $0x10] sm:$0xff]  ;;  %v20_v37 = vld [vmem:[%s1013_s0 + $0x18] sm:$0xff]  ;;  %v343_v38 = vld [vmem:[%s1014_s3 + $0x80] sm:$0xff] }
  0x18   :  { %545 = vmatprep.subr.bf16.mxu1 %v544_v9  ;;  %v344_v39 = vld [vmem:[%s1014_s3 + $0x88] sm:$0xff]  ;;  %v327_v41 = vld [vmem:[%s1014_s3] sm:$0xff]  ;;  %v346_v44 = vld [vmem:[%s1014_s3 + $0x98] sm:$0xff] }
  0x19   :  { %519 = vmatpush1.bf16.msra.mxu0 %v518_v58  ;;  %v560_v40 = vpack.c.bf16 %v344_v39, %v343_v38  ;;  %v328_v42 = vld [vmem:[%s1014_s3 + $0x8] sm:$0xff]  ;;  %v329_v46 = vld [vmem:[%s1014_s3 + $0x10] sm:$0xff]  ;;  %v330_v47 = vld [vmem:[%s1014_s3 + $0x18] sm:$0xff] }
  0x1a   :  { %521 = vmatprep.subr.bf16.mxu0 %v520_v63  ;;  %v562_v43 = vpack.c.bf16 %v328_v42, %v327_v41  ;;  %v566_v48 = vpack.c.bf16 %v330_v47, %v329_v46  ;;  %v347_v49 = vld [vmem:[%s1014_s3 + $0xa0] sm:$0xff]  ;;  %v348_v50 = vld [vmem:[%s1014_s3 + $0xa8] sm:$0xff]  ;;  %v349_v55 = vld [vmem:[%s1014_s3 + $0xb0] sm:$0xff] }
  0x1b   :  { %547 = vmatpush1.bf16.msra.mxu1 %v546_v16  ;;  %v568_v51 = vpack.c.bf16 %v348_v50, %v347_v49  ;;  %v331_v52 = vld [vmem:[%s1014_s3 + $0x20] sm:$0xff]  ;;  %v332_v53 = vld [vmem:[%s1014_s3 + $0x28] sm:$0xff]  ;;  %v350_v56 = vld [vmem:[%s1014_s3 + $0xb8] sm:$0xff] }
  0x1c   :  { %549 = vmatprep.subr.bf16.mxu1 %v548_v18  ;;  %v570_v54 = vpack.c.bf16 %v332_v53, %v331_v52  ;;  %v572_v57 = vpack.c.bf16 %v350_v56, %v349_v55  ;;  %v333_v58 = vld [vmem:[%s1014_s3 + $0x30] sm:$0xff]  ;;  %v334_v59 = vld [vmem:[%s1014_s3 + $0x38] sm:$0xff]  ;;  %v351_v61 = vld [vmem:[%s1014_s3 + $0xc0] sm:$0xff] }
  0x1d   :  { %523 = vmatpush1.bf16.msra.mxu0 %v522_v7  ;;  %v574_v60 = vpack.c.bf16 %v334_v59, %v333_v58  ;;  %v352_v62 = vld [vmem:[%s1014_s3 + $0xc8] sm:$0xff]  ;;  %v335_v0 = vld [vmem:[%s1014_s3 + $0x40] sm:$0xff]  ;;  %v353_v4 = vld [vmem:[%s1014_s3 + $0xd0] sm:$0xff] }
  0x1e   :  { %525 = vmatprep.subr.bf16.mxu0 %v524_v12  ;;  %v576_v63 = vpack.c.bf16 %v352_v62, %v351_v61  ;;  %v336_v1 = vld [vmem:[%s1014_s3 + $0x48] sm:$0xff]  ;;  %v354_v5 = vld [vmem:[%s1014_s3 + $0xd8] sm:$0xff]  ;;  %v337_v7 = vld [vmem:[%s1014_s3 + $0x50] sm:$0xff] }
  0x1f   :  { %551 = vmatpush1.bf16.msra.mxu1 %v550_v23  ;;  %v578_v2 = vpack.c.bf16 %v336_v1, %v335_v0  ;;  %v580_v6 = vpack.c.bf16 %v354_v5, %v353_v4  ;;  %v338_v8 = vld [vmem:[%s1014_s3 + $0x58] sm:$0xff]  ;;  %v355_v10 = vld [vmem:[%s1014_s3 + $0xe0] sm:$0xff]  ;;  %v356_v11 = vld [vmem:[%s1014_s3 + $0xe8] sm:$0xff] }
  0x20   :  { %553 = vmatprep.subr.bf16.mxu1 %v552_v25  ;;  %v582_v9 = vpack.c.bf16 %v338_v8, %v337_v7  ;;  %v584_v12 = vpack.c.bf16 %v356_v11, %v355_v10  ;;  %v339_v13 = vld [vmem:[%s1014_s3 + $0x60] sm:$0xff]  ;;  %v340_v14 = vld [vmem:[%s1014_s3 + $0x68] sm:$0xff]  ;;  %v357_v16 = vld [vmem:[%s1014_s3 + $0xf0] sm:$0xff] }
  0x21   :  { %527 = vmatpush1.bf16.msra.mxu0 %v526_v17  ;;  %v586_v15 = vpack.c.bf16 %v340_v14, %v339_v13  ;;  %v358_v17 = vld [vmem:[%s1014_s3 + $0xf8] sm:$0xff]  ;;  %v341_v19 = vld [vmem:[%s1014_s3 + $0x70] sm:$0xff] }
  0x22   :  { %561 = vmatprep.subr.bf16.mxu0 %v560_v40  ;;  %v588_v18 = vpack.c.bf16 %v358_v17, %v357_v16  ;;  %v342_v20 = vld [vmem:[%s1014_s3 + $0x78] sm:$0xff] }
  0x23   :  { %555 = vmatpush1.bf16.msra.mxu1 %v554_v30  ;;  %v590_v21 = vpack.c.bf16 %v342_v20, %v341_v19 }
  0x24   :  { %118 = vmatmul.mubr.f32.vlgmr.msra.gmra.mrb[0].mxu0 %v17_v24  ;;  %557 = vmatprep.subr.bf16.mxu1 %v556_v32 }
  0x25   :  { %123 = vmatprep.mubr.f32.mxu0 %v641_v3  ;;  %563 = vmatpush3.bf16.msra.mxu0 %v562_v43 }
  0x27   :  { %559 = vmatpush1.bf16.msra.mxu1 %v558_v35 }
  0x28   :  { %124 = vmatmul.mubr.f32.gmra.mrb[2].mxu0 %v18_v31  ;;  %592 = vmatprep.subr.bf16.mxu1 %v560_v40 }
  0x29   :  { %129 = vmatprep.mubr.f32.mxu0 %v641_v3 }
  0x2a   :  { %239 = vmatmul.mubr.f32.vlgmr.msra.gmra.mrb[0].mxu1 %v17_v24 }
  0x2b   :  { %244 = vmatprep.mubr.f32.mxu1 %v641_v3  ;;  %600 = vmatpush3.bf16.msra.mxu1 %v562_v43 }
  0x2c   :  { %130 = vmatmul.mubr.f32.gmra.mrb[4].mxu0 %v19_v36 }
  0x2d   :  { %135 = vmatprep.mubr.f32.mxu0 %v641_v3 }
  0x2e   :  { %245 = vmatmul.mubr.f32.gmra.mrb[2].mxu1 %v18_v31 }
  0x2f   :  { %250 = vmatprep.mubr.f32.mxu1 %v641_v3 }
  0x30   :  { %136 = vmatmul.mubr.f32.gmra.mrb[6].mxu0 %v20_v37 }
  0x32   :  { %251 = vmatmul.mubr.f32.gmra.mrb[4].mxu1 %v19_v36 }
  0x33   :  { %256 = vmatprep.mubr.f32.mxu1 %v641_v3  ;;  %v345_v3 = vld [vmem:[%s1014_s3 + $0x90] sm:$0xff] }
  0x34   :  { %v564_v45 = vpack.c.bf16 %v346_v44, %v345_v3 }
  0x36   :  { %257 = vmatmul.mubr.f32.gmra.mrb[6].mxu1 %v20_v37  ;;  %565 = vmatprep.subr.bf16.mxu0 %v564_v45 }
  0x37   :  { %593 = vmatprep.subr.bf16.mxu1 %v564_v45  ;;  %567 = vmatpush3.bf16.msra.mxu0 %v566_v48 }
  0x38   :  { %601 = vmatpush3.bf16.msra.mxu1 %v566_v48  ;;  %569 = vmatprep.subr.bf16.mxu0 %v568_v51 }
  0x39   :  { %594 = vmatprep.subr.bf16.mxu1 %v568_v51 }
  0x3b   :  { %571 = vmatpush3.bf16.msra.mxu0 %v570_v54 }
  0x3c   :  { %602 = vmatpush3.bf16.msra.mxu1 %v570_v54  ;;  %573 = vmatprep.subr.bf16.mxu0 %v572_v57 }
  0x3d   :  { %595 = vmatprep.subr.bf16.mxu1 %v572_v57 }
  0x3f   :  { %575 = vmatpush3.bf16.msra.mxu0 %v574_v60 }
  0x40   :  { %603 = vmatpush3.bf16.msra.mxu1 %v574_v60  ;;  %577 = vmatprep.subr.bf16.mxu0 %v576_v63 }
  0x41   :  { %596 = vmatprep.subr.bf16.mxu1 %v576_v63 }
  0x43   :  { %579 = vmatpush3.bf16.msra.mxu0 %v578_v2 }
  0x44   :  { %604 = vmatpush3.bf16.msra.mxu1 %v578_v2  ;;  %581 = vmatprep.subr.bf16.mxu0 %v580_v6 }
  0x45   :  { %597 = vmatprep.subr.bf16.mxu1 %v580_v6 }
  0x47   :  { %583 = vmatpush3.bf16.msra.mxu0 %v582_v9 }
  0x48   :  { %605 = vmatpush3.bf16.msra.mxu1 %v582_v9  ;;  %585 = vmatprep.subr.bf16.mxu0 %v584_v12 }
  0x49   :  { %598 = vmatprep.subr.bf16.mxu1 %v584_v12 }
  0x4b   :  { %587 = vmatpush3.bf16.msra.mxu0 %v586_v15 }
  0x4c   :  { %606 = vmatpush3.bf16.msra.mxu1 %v586_v15  ;;  %589 = vmatprep.subr.bf16.mxu0 %v588_v18 }
  0x4d   :  { %599 = vmatprep.subr.bf16.mxu1 %v588_v18 }
  0x4f   :  { %591 = vmatpush3.bf16.msra.mxu0 %v590_v21 }
  0x50   :  { %607 = vmatpush3.bf16.msra.mxu1 %v590_v21 }
  0xf7   :  { %v119_v22 = vpop.f32.mrb[0].mxu0 }
  0xf8   :  { %v263_v23 = vsub.f32 0.0, %v119_v22  ;;  %v121_v24 = vpop.f32.mrb[1].mxu0 }
  0xf9   :  { %v264_v25 = vsub.f32 0.0, %v121_v24 }
  0xfa   :  { %v271_v26 = vmul.f32 1.442695, %v263_v23 }
  0xfb   :  { %v273_v27 = vmul.f32 1.442695, %v264_v25  ;;  %v975_v28 = vpop.f32.mrb[2].mxu0 }
  0xfc   :  { %609 = vpow2.f32 %v271_v26  ;;  %v265_v29 = vsub.f32 0.0, %v975_v28  ;;  %v978_v30 = vpop.f32.mrb[3].mxu0 }
  0xfd   :  { %611 = vpow2.f32 %v273_v27  ;;  %v266_v31 = vsub.f32 0.0, %v978_v30  ;;  %v240_v39 = vpop.f32.mrb[0].mxu1 }
  0xfe   :  { %v275_v32 = vmul.f32 1.442695, %v265_v29  ;;  %v242_v42 = vpop.f32.mrb[1].mxu1 }
  0xff   :  { %v277_v33 = vmul.f32 1.442695, %v266_v31  ;;  %v981_v34 = vpop.f32.mrb[4].mxu0 }
 0x100   :  { %613 = vpow2.f32 %v275_v32  ;;  %v267_v35 = vsub.f32 0.0, %v981_v34  ;;  %v984_v36 = vpop.f32.mrb[5].mxu0 }
 0x101   :  { %615 = vpow2.f32 %v277_v33  ;;  %v268_v37 = vsub.f32 0.0, %v984_v36  ;;  %v246_v47 = vpop.f32.mrb[2].mxu1 }
 0x102   :  { %v279_v38 = vmul.f32 1.442695, %v267_v35  ;;  %v248_v51 = vpop.f32.mrb[3].mxu1 }
 0x103   :  { %v281_v40 = vmul.f32 1.442695, %v268_v37  ;;  %v987_v41 = vpop.f32.mrb[6].mxu0 }
 0x104   :  { %617 = vpow2.f32 %v279_v38  ;;  %v269_v43 = vsub.f32 0.0, %v987_v41  ;;  %v990_v3 = vpop.f32.mrb[7].mxu0 }
 0x105   :  { %619 = vpow2.f32 %v281_v40  ;;  %v270_v44 = vsub.f32 0.0, %v990_v3  ;;  %v252_v54 = vpop.f32.mrb[4].mxu1 }
 0x106   :  { %v610_v45 = vpop.eup %609  ;;  %v283_v46 = vmul.f32 1.442695, %v269_v43  ;;  %v254_v57 = vpop.f32.mrb[5].mxu1 }
 0x107   :  { %v612_v48 = vpop.eup %611  ;;  %v287_v49 = vadd.f32 1.0, %v610_v45  ;;  %v285_v50 = vmul.f32 1.442695, %v270_v44 }
 0x108   :  { %v288_v52 = vadd.f32 1.0, %v612_v48  ;;  %621 = vpow2.f32 %v283_v46 }
 0x109   :  { %623 = vrcp.f32 %v287_v49  ;;  %v258_v60 = vpop.f32.mrb[6].mxu1 }
 0x10a   :  { %v614_v53 = vpop.eup %613  ;;  %625 = vrcp.f32 %v288_v52  ;;  %v260_v63 = vpop.f32.mrb[7].mxu1 }
 0x10b   :  { %v616_v55 = vpop.eup %615  ;;  %v289_v56 = vadd.f32 1.0, %v614_v53  ;;  %627 = vpow2.f32 %v285_v50 }
 0x10c   :  { %v290_v58 = vadd.f32 1.0, %v616_v55 }
 0x10d   :  { %629 = vrcp.f32 %v289_v56 }
 0x10e   :  { %v618_v59 = vpop.eup %617  ;;  %631 = vrcp.f32 %v290_v58 }
 0x10f   :  { %v620_v61 = vpop.eup %619  ;;  %v291_v62 = vadd.f32 1.0, %v618_v59 }
 0x110   :  { %v292_v0 = vadd.f32 1.0, %v620_v61 }
 0x111   :  { %633 = vrcp.f32 %v291_v62 }
 0x112   :  { %v622_v1 = vpop.eup %621  ;;  %635 = vrcp.f32 %v292_v0 }
 0x113   :  { %v624_v2 = vpop.eup %623  ;;  %v293_v4 = vadd.f32 1.0, %v622_v1 }
 0x114   :  { %v626_v5 = vpop.eup %625  ;;  %v311_v6 = vmul.f32 %v624_v2, %v119_v22 }
 0x115   :  { %v628_v7 = vpop.eup %627  ;;  %v312_v8 = vmul.f32 %v626_v5, %v121_v24  ;;  %637 = vrcp.f32 %v293_v4 }
 0x116   :  { %v294_v9 = vadd.f32 1.0, %v628_v7  ;;  %v319_v10 = vmul.f32 %v311_v6, %v240_v39 }
 0x117   :  { %v630_v11 = vpop.eup %629  ;;  %v320_v12 = vmul.f32 %v312_v8, %v242_v42 }
 0x118   :  { %v632_v13 = vpop.eup %631  ;;  %v313_v14 = vmul.f32 %v630_v11, %v975_v28  ;;  %639 = vrcp.f32 %v294_v9 }
 0x119   :  { %v314_v15 = vmul.f32 %v632_v13, %v978_v30  ;;  %423 = vmatprep.mubr.f32.mxu0 %v320_v12 }
 0x11a   :  { %v321_v16 = vmul.f32 %v313_v14, %v246_v47  ;;  %424 = vmatmul.mubr.f32.vlgmr.msra.gmra.mrb[8].mxu0 %v319_v10 }
 0x11b   :  { %v634_v17 = vpop.eup %633  ;;  %v322_v18 = vmul.f32 %v314_v15, %v248_v51 }
 0x11c   :  { %v636_v19 = vpop.eup %635  ;;  %v315_v20 = vmul.f32 %v634_v17, %v981_v34 }
 0x11d   :  { %v316_v21 = vmul.f32 %v636_v19, %v984_v36  ;;  %428 = vmatprep.mubr.f32.mxu0 %v322_v18 }
 0x11e   :  { %v323_v22 = vmul.f32 %v315_v20, %v252_v54  ;;  %429 = vmatmul.mubr.f32.gmra.mrb[10].mxu0 %v321_v16 }
 0x11f   :  { %v638_v23 = vpop.eup %637  ;;  %v324_v24 = vmul.f32 %v316_v21, %v254_v57 }
 0x120   :  { %v317_v25 = vmul.f32 %v638_v23, %v987_v41 }
 0x121   :  { %433 = vmatprep.mubr.f32.mxu1 %v324_v24 }
 0x122   :  { %v640_v26 = vpop.eup %639  ;;  %v325_v27 = vmul.f32 %v317_v25, %v258_v60  ;;  %434 = vmatmul.mubr.f32.vlgmr.msra.gmra.mrb[8].mxu1 %v323_v22 }
 0x123   :  { %v318_v28 = vmul.f32 %v640_v26, %v990_v3 }
 0x125   :  { %v326_v29 = vmul.f32 %v318_v28, %v260_v63 }
 0x127   :  { %438 = vmatprep.mubr.f32.mxu1 %v326_v29 }
 0x128   :  { %439 = vmatmul.mubr.f32.gmra.mrb[10].mxu1 %v325_v27 }
 0x1ed   :  { %v484_v30 = vpop.f32.mrb[8].mxu0 }
 0x1ee   :  { %v485_v31 = vpop.f32.mrb[9].mxu0 }
 0x1ef   :  { %v486_v32 = vadd.f32 %v485_v31, %v484_v30 }
 0x1f1   :  { %444 = vst [vmem:[%s1015_s4] sm:$0xff] %v486_v32  ;;  %v487_v33 = vpop.f32.mrb[10].mxu0 }
 0x1f2   :  { %v488_v34 = vpop.f32.mrb[11].mxu0 }
 0x1f3   :  { %v489_v35 = vadd.f32 %v488_v34, %v487_v33 }
 0x1f5   :  { %445 = vst [vmem:[%s1015_s4 + $0x8] sm:$0xff] %v489_v35  ;;  %v490_v36 = vpop.f32.mrb[8].mxu1 }
 0x1f6   :  { %v491_v37 = vpop.f32.mrb[9].mxu1 }
 0x1f7   :  { %v492_v38 = vadd.f32 %v491_v37, %v490_v36 }
 0x1f9   :  { %446 = vst [vmem:[%s1015_s4 + $0x10] sm:$0xff] %v492_v38 }
 0x1fb   :  { %v493_v39 = vpop.f32.mrb[10].mxu1 }
 0x1fc   :  { %v494_v40 = vpop.f32.mrb[11].mxu1 }
 0x1fd   :  { %v495_v41 = vadd.f32 %v494_v40, %v493_v39 }
 0x1ff   :  { %447 = vst [vmem:[%s1015_s4 + $0x18] sm:$0xff] %v495_v41 }

</bundles_post_ra>
